<compile_context>
chip_gen: v7x
topology: tpu7x:2x2x1
jax: 0.10.0
libtpu: 0.0.40
codegen_flags: <defaults>
</compile_context>

<pallas_src>
import math

import jax
import jax.numpy as jnp
from jax.experimental import pallas as pl
from jax.experimental.pallas import tpu as pltpu

NUM_CLASSES = 10          # args.num_classes
COMPUTE_DTYPE = jnp.bfloat16   # matmul operand / activation dtype (set to jnp.float32 for bit-closer ref)


# ----------------------------------------------------------------------------
# helpers
# ----------------------------------------------------------------------------
def _round_up(x, m):
    return ((x + m - 1) // m) * m


def _choose_tile(m, max_tile=512):
    """Row tile: multiple of 16 (bf16 sublane pack), capped at max_tile."""
    tm = max_tile if m >= max_tile else _round_up(max(m, 1), 16)
    m_pad = _round_up(m, tm)
    return tm, m_pad


# ----------------------------------------------------------------------------
# Kernel 1: fused conv (as pooled-patch matmul) + bias + 2x2 max-pool + ReLU.
#   out = relu( max_{pq in 2x2}( P_pq @ W ) + b )
# (bias & relu commute with the max, so this equals pool(relu(conv(x)+b)).)
# ----------------------------------------------------------------------------
def _conv_pool_relu_kernel(p00_ref, p01_ref, p10_ref, p11_ref, w_ref, b_ref, o_ref):
    w = w_ref[...]                                   # (K, Cout), COMPUTE_DTYPE

    def mm(p_ref):
        return jnp.dot(p_ref[...], w, preferred_element_type=jnp.float32)

    z = jnp.maximum(jnp.maximum(mm(p00_ref), mm(p01_ref)),
                    jnp.maximum(mm(p10_ref), mm(p11_ref)))     # f32
    y = jnp.maximum(z + b_ref[...], 0.0)                        # f32 elementwise
    o_ref[...] = y.astype(o_ref.dtype)


def conv_pool_relu(p00, p01, p10, p11, w, b):
    # p_pq: (M, K) patch matrices (one per 2x2 pool offset); w: (K, Cout); b: (1, Cout)
    m, k = p00.shape
    cout = w.shape[1]
    tm, m_pad = _choose_tile(m)
    if m_pad != m:
        pad = ((0, m_pad - m), (0, 0))
        p00, p01, p10, p11 = [jnp.pad(a, pad) for a in (p00, p01, p10, p11)]

    row_spec = pl.BlockSpec((tm, k), lambda i: (i, 0))
    out = pl.pallas_call(
        _conv_pool_relu_kernel,
        out_shape=jax.ShapeDtypeStruct((m_pad, cout), COMPUTE_DTYPE),
        grid=(m_pad // tm,),
        in_specs=[row_spec, row_spec, row_spec, row_spec,
                  pl.BlockSpec((k, cout), lambda i: (0, 0)),
                  pl.BlockSpec((1, cout), lambda i: (0, 0))],
        out_specs=pl.BlockSpec((tm, cout), lambda i: (i, 0)),
        compiler_params=pltpu.CompilerParams(dimension_semantics=("parallel",)),
    )(p00, p01, p10, p11, w, b)
    return out[:m]


# ----------------------------------------------------------------------------
# Kernel 2: full FC head (fused fc1 / fc2 / fc3 weights) + log_softmax.
# ----------------------------------------------------------------------------
def _head_kernel(x_ref, w1_ref, b1_ref, w2_ref, b2_ref, w3_ref, b3_ref, o_ref):
    def dense(h, w_ref, b_ref):
        return jnp.dot(h.astype(w_ref.dtype), w_ref[...],
                       preferred_element_type=jnp.float32) + b_ref[...]

    h = jnp.maximum(dense(x_ref[...], w1_ref, b1_ref), 0.0)
    h = jnp.maximum(dense(h, w2_ref, b2_ref), 0.0)
    z = dense(h, w3_ref, b3_ref)

    # numerically-stable log_softmax along the class axis (f32 VPU/EUP path)
    m = jnp.max(z, axis=-1, keepdims=True)
    s = z - m
    lse = jnp.log(jnp.sum(jnp.exp(s), axis=-1, keepdims=True))
    o_ref[...] = (s - lse).astype(o_ref.dtype)


def mlp_head(x, w1, b1, w2, b2, w3, b3):
    n, d = x.shape
    c = w3.shape[1]
    tm, n_pad = _choose_tile(n, max_tile=256)
    if n_pad != n:
        x = jnp.pad(x, ((0, n_pad - n), (0, 0)))

    out = pl.pallas_call(
        _head_kernel,
        out_shape=jax.ShapeDtypeStruct((n_pad, c), jnp.float32),
        grid=(n_pad // tm,),
        in_specs=[pl.BlockSpec((tm, d), lambda i: (i, 0)),
                  pl.BlockSpec(w1.shape, lambda i: (0, 0)),
                  pl.BlockSpec(b1.shape, lambda i: (0, 0)),
                  pl.BlockSpec(w2.shape, lambda i: (0, 0)),
                  pl.BlockSpec(b2.shape, lambda i: (0, 0)),
                  pl.BlockSpec(w3.shape, lambda i: (0, 0)),
                  pl.BlockSpec(b3.shape, lambda i: (0, 0))],
        out_specs=pl.BlockSpec((tm, c), lambda i: (i, 0)),
        compiler_params=pltpu.CompilerParams(dimension_semantics=("parallel",)),
    )(x, w1, b1, w2, b2, w3, b3)
    return out[:n]


# ----------------------------------------------------------------------------
# Glue: pooled-position im2col (4 slabs, one per 2x2 pool offset), NHWC order.
# ----------------------------------------------------------------------------
def _pooled_patches_conv1(x):
    # x: (N, 1, 28, 28) NCHW f32 -> 4 slabs of (N*14*14, 25), feature order (kh, kw).
    n = x.shape[0]
    xp = jnp.pad(x[:, 0], ((0, 0), (2, 2), (2, 2))).astype(COMPUTE_DTYPE)  # (N, 32, 32)
    slabs = []
    for p in range(2):
        for q in range(2):
            taps = []
            for i in range(5):
                for j in range(5):
                    taps.append(xp[:, p + i:p + i + 27:2, q + j:q + j + 27:2])  # (N,14,14)
            slabs.append(jnp.stack(taps, axis=-1).reshape(n * 14 * 14, 25))
    return slabs


def _pooled_patches_conv2(y1):
    # y1: (N, 14, 14, 6) NHWC -> 4 slabs of (N*5*5, 150), feature order (kh, kw, cin).
    n = y1.shape[0]
    slabs = []
    for p in range(2):
        for q in range(2):
            taps = []
            for i in range(5):
                for j in range(5):
                    taps.append(y1[:, p + i:p + i + 9:2, q + j:q + j + 9:2, :])  # (N,5,5,6)
            slabs.append(jnp.stack(taps, axis=3).reshape(n * 5 * 5, 25 * 6))
    return slabs


# ----------------------------------------------------------------------------
# Deterministic parameter init (PyTorch-style uniform), with dual-branch fusion
# (W1+W2, b1+b2) and layout permutations for the NHWC data path.
# ----------------------------------------------------------------------------
def init_params(key, num_classes=NUM_CLASSES):
    ks = iter(jax.random.split(key, 20))

    def u(shape, bound):
        return jax.random.uniform(next(ks), shape, jnp.float32, -bound, bound)

    p = {}

    # conv11 + conv12: Conv2d(1, 6, 5), fused.  Patch feature order = (kh, kw).
    bnd = 1.0 / math.sqrt(1 * 5 * 5)
    w11, b11 = u((6, 1, 5, 5), bnd), u((6,), bnd)
    w12, b12 = u((6, 1, 5, 5), bnd), u((6,), bnd)
    p["w_c1"] = (w11 + w12).reshape(6, 25).T.astype(COMPUTE_DTYPE)        # (25, 6)
    p["b_c1"] = (b11 + b12).reshape(1, 6)                                  # f32

    # conv21 + conv22: Conv2d(6, 16, 5), fused.  Permute (cin,kh,kw) -> (kh,kw,cin).
    bnd = 1.0 / math.sqrt(6 * 5 * 5)
    w21, b21 = u((16, 6, 5, 5), bnd), u((16,), bnd)
    w22, b22 = u((16, 6, 5, 5), bnd), u((16,), bnd)
    p["w_c2"] = ((w21 + w22).transpose(0, 2, 3, 1)
                 .reshape(16, 150).T.astype(COMPUTE_DTYPE))                # (150, 16)
    p["b_c2"] = (b21 + b22).reshape(1, 16)

    # fc11 + fc12: Linear(400, 120), fused.  Permute input features (c,h,w) -> (h,w,c).
    bnd = 1.0 / math.sqrt(400)
    wf11, bf11 = u((120, 400), bnd), u((120,), bnd)
    wf12, bf12 = u((120, 400), bnd), u((120,), bnd)
    p["w_f1"] = ((wf11 + wf12).reshape(120, 16, 5, 5).transpose(0, 2, 3, 1)
                 .reshape(120, 400).T.astype(COMPUTE_DTYPE))               # (400, 120)
    p["b_f1"] = (bf11 + bf12).reshape(1, 120)

    # fc21 + fc22: Linear(120, 84), fused.
    bnd = 1.0 / math.sqrt(120)
    wf21, bf21 = u((84, 120), bnd), u((84,), bnd)
    wf22, bf22 = u((84, 120), bnd), u((84,), bnd)
    p["w_f2"] = (wf21 + wf22).T.astype(COMPUTE_DTYPE)                      # (120, 84)
    p["b_f2"] = (bf21 + bf22).reshape(1, 84)

    # fc31 + fc32: Linear(84, num_classes), fused.
    bnd = 1.0 / math.sqrt(84)
    wf31, bf31 = u((num_classes, 84), bnd), u((num_classes,), bnd)
    wf32, bf32 = u((num_classes, 84), bnd), u((num_classes,), bnd)
    p["w_f3"] = (wf31 + wf32).T.astype(COMPUTE_DTYPE)                      # (84, C)
    p["b_f3"] = (bf31 + bf32).reshape(1, num_classes)
    return p


# ----------------------------------------------------------------------------
# Forward pass (mirrors CNNMnist1.forward).
# ----------------------------------------------------------------------------
def forward(params, x):
    n = x.shape[0]

    # pool(relu(conv11(x) + conv12(x)))  ->  (N, 14, 14, 6) NHWC
    s1 = _pooled_patches_conv1(x)
    y1 = conv_pool_relu(*s1, params["w_c1"], params["b_c1"])     # (N*196, 6)
    y1 = y1.reshape(n, 14, 14, 6)

    # pool(relu(conv21(y1) + conv22(y1)))  ->  (N, 5, 5, 16) NHWC
    s2 = _pooled_patches_conv2(y1)
    y2 = conv_pool_relu(*s2, params["w_c2"], params["b_c2"])     # (N*25, 16)
    flat = y2.reshape(n, 5 * 5 * 16)                              # (h, w, c) flatten; fc1 weights permuted to match

    # fc head + log_softmax (fused dual weights), log-probs in f32
    return mlp_head(flat, params["w_f1"], params["b_f1"],
                    params["w_f2"], params["b_f2"],
                    params["w_f3"], params["b_f3"])


if __name__ == "__main__":
    key = jax.random.PRNGKey(0)
    pkey, xkey = jax.random.split(key)
    params = init_params(pkey)
    # MNIST-shaped input required by the FC dims (16*5*5): N=2, C=1, 28x28.
    x = jax.random.normal(xkey, (2, 1, 28, 28), jnp.float32)

    out = jax.jit(forward)(params, x)
    jax.block_until_ready(out)
    assert out.shape == (2, NUM_CLASSES)
    # log_softmax rows should exponentiate-sum to 1.
    assert jnp.allclose(jnp.sum(jnp.exp(out), axis=1), 1.0, atol=1e-4)
    print("KERNEL_OK")
</pallas_src>

<mosaic_0001>
module attributes {stable_mosaic.version = 11 : i64} {
  func.func @_conv_pool_relu_kernel(%arg0: i32, %arg1: memref<400x25xbf16, #tpu.memory_space<vmem>>, %arg2: memref<400x25xbf16, #tpu.memory_space<vmem>>, %arg3: memref<400x25xbf16, #tpu.memory_space<vmem>>, %arg4: memref<400x25xbf16, #tpu.memory_space<vmem>>, %arg5: memref<25x6xbf16, #tpu.memory_space<vmem>>, %arg6: memref<1x6xf32, #tpu.memory_space<vmem>>, %arg7: memref<400x6xbf16, #tpu.memory_space<vmem>>) attributes {dimension_semantics = [#tpu.dimension_semantics<parallel>], iteration_bounds = array<i64: 1>, scalar_prefetch = 0 : i64, scratch_operands = 0 : i64, tpu.core_type = #tpu.core_type<tc>, window_params = [{transform_indices = @transform_0, window_bounds = array<i64: 400, 25>}, {transform_indices = @transform_1, window_bounds = array<i64: 400, 25>}, {transform_indices = @transform_2, window_bounds = array<i64: 400, 25>}, {transform_indices = @transform_3, window_bounds = array<i64: 400, 25>}, {pipeline_mode = #tpu.pipeline_mode<synchronous>, transform_indices = @transform_4, window_bounds = array<i64: 25, 6>}, {pipeline_mode = #tpu.pipeline_mode<synchronous>, transform_indices = @transform_5, window_bounds = array<i64: 1, 6>}, {transform_indices = @transform_6, window_bounds = array<i64: 400, 6>}]} {
    %c0 = arith.constant 0 : index
    %c0_0 = arith.constant 0 : index
    %0 = vector.load %arg5[%c0, %c0_0] : memref<25x6xbf16, #tpu.memory_space<vmem>>, vector<25x6xbf16>
    %c0_1 = arith.constant 0 : index
    %c0_2 = arith.constant 0 : index
    %1 = vector.load %arg1[%c0_1, %c0_2] : memref<400x25xbf16, #tpu.memory_space<vmem>>, vector<400x25xbf16>
    %cst = arith.constant dense<0.000000e+00> : vector<400x6xf32>
    %2 = tpu.matmul %1, %0, %cst {dimension_numbers = #tpu.dot_dimension_numbers<[1], [0], [0], [1], [0, 0, 1, 1], [], []>} : vector<400x25xbf16>, vector<25x6xbf16>, vector<400x6xf32> -> vector<400x6xf32>
    %c0_3 = arith.constant 0 : index
    %c0_4 = arith.constant 0 : index
    %3 = vector.load %arg2[%c0_3, %c0_4] : memref<400x25xbf16, #tpu.memory_space<vmem>>, vector<400x25xbf16>
    %cst_5 = arith.constant dense<0.000000e+00> : vector<400x6xf32>
    %4 = tpu.matmul %3, %0, %cst_5 {dimension_numbers = #tpu.dot_dimension_numbers<[1], [0], [0], [1], [0, 0, 1, 1], [], []>} : vector<400x25xbf16>, vector<25x6xbf16>, vector<400x6xf32> -> vector<400x6xf32>
    %5 = arith.maximumf %2, %4 : vector<400x6xf32>
    %c0_6 = arith.constant 0 : index
    %c0_7 = arith.constant 0 : index
    %6 = vector.load %arg3[%c0_6, %c0_7] : memref<400x25xbf16, #tpu.memory_space<vmem>>, vector<400x25xbf16>
    %cst_8 = arith.constant dense<0.000000e+00> : vector<400x6xf32>
    %7 = tpu.matmul %6, %0, %cst_8 {dimension_numbers = #tpu.dot_dimension_numbers<[1], [0], [0], [1], [0, 0, 1, 1], [], []>} : vector<400x25xbf16>, vector<25x6xbf16>, vector<400x6xf32> -> vector<400x6xf32>
    %c0_9 = arith.constant 0 : index
    %c0_10 = arith.constant 0 : index
    %8 = vector.load %arg4[%c0_9, %c0_10] : memref<400x25xbf16, #tpu.memory_space<vmem>>, vector<400x25xbf16>
    %cst_11 = arith.constant dense<0.000000e+00> : vector<400x6xf32>
    %9 = tpu.matmul %8, %0, %cst_11 {dimension_numbers = #tpu.dot_dimension_numbers<[1], [0], [0], [1], [0, 0, 1, 1], [], []>} : vector<400x25xbf16>, vector<25x6xbf16>, vector<400x6xf32> -> vector<400x6xf32>
    %10 = arith.maximumf %7, %9 : vector<400x6xf32>
    %11 = arith.maximumf %5, %10 : vector<400x6xf32>
    %c0_12 = arith.constant 0 : index
    %c0_13 = arith.constant 0 : index
    %12 = vector.load %arg6[%c0_12, %c0_13] : memref<1x6xf32, #tpu.memory_space<vmem>>, vector<1x6xf32>
    %13 = vector.broadcast %12 : vector<1x6xf32> to vector<400x6xf32>
    %14 = arith.addf %11, %13 : vector<400x6xf32>
    %cst_14 = arith.constant 0.000000e+00 : f32
    %15 = vector.broadcast %cst_14 : f32 to vector<400x6xf32>
    %16 = arith.maximumf %14, %15 : vector<400x6xf32>
    %17 = arith.truncf %16 : vector<400x6xf32> to vector<400x6xbf16>
    %c0_15 = arith.constant 0 : index
    %c0_16 = arith.constant 0 : index
    %18 = vector.load %arg7[%c0_15, %c0_16] : memref<400x6xbf16, #tpu.memory_space<vmem>>, vector<400x6xbf16>
    tpu.vector_store %arg7[%c0_15, %c0_16], %17 {strides = array<i32>} : memref<400x6xbf16, #tpu.memory_space<vmem>>, vector<400x6xbf16>,
    return
  }
  func.func @transform_0(%arg0: i32) -> (i32, i32) {
    %c0_i32 = arith.constant 0 : i32
    %c0_i32_0 = arith.constant 0 : i32
    return %arg0, %c0_i32 : i32, i32
  }
  func.func @transform_1(%arg0: i32) -> (i32, i32) {
    %c0_i32 = arith.constant 0 : i32
    %c0_i32_0 = arith.constant 0 : i32
    return %arg0, %c0_i32 : i32, i32
  }
  func.func @transform_2(%arg0: i32) -> (i32, i32) {
    %c0_i32 = arith.constant 0 : i32
    %c0_i32_0 = arith.constant 0 : i32
    return %arg0, %c0_i32 : i32, i32
  }
  func.func @transform_3(%arg0: i32) -> (i32, i32) {
    %c0_i32 = arith.constant 0 : i32
    %c0_i32_0 = arith.constant 0 : i32
    return %arg0, %c0_i32 : i32, i32
  }
  func.func @transform_4(%arg0: i32) -> (i32, i32) {
    %c0_i32 = arith.constant 0 : i32
    %c0_i32_0 = arith.constant 0 : i32
    %c0_i32_1 = arith.constant 0 : i32
    return %c0_i32, %c0_i32_0 : i32, i32
  }
  func.func @transform_5(%arg0: i32) -> (i32, i32) {
    %c0_i32 = arith.constant 0 : i32
    %c0_i32_0 = arith.constant 0 : i32
    %c0_i32_1 = arith.constant 0 : i32
    return %c0_i32, %c0_i32_0 : i32, i32
  }
  func.func @transform_6(%arg0: i32) -> (i32, i32) {
    %c0_i32 = arith.constant 0 : i32
    %c0_i32_0 = arith.constant 0 : i32
    return %arg0, %c0_i32 : i32, i32
  }
}

module attributes {stable_mosaic.version = 11 : i64} {
  func.func @_conv_pool_relu_kernel(%arg0: i32, %arg1: memref<64x150xbf16, #tpu.memory_space<vmem>>, %arg2: memref<64x150xbf16, #tpu.memory_space<vmem>>, %arg3: memref<64x150xbf16, #tpu.memory_space<vmem>>, %arg4: memref<64x150xbf16, #tpu.memory_space<vmem>>, %arg5: memref<150x16xbf16, #tpu.memory_space<vmem>>, %arg6: memref<1x16xf32, #tpu.memory_space<vmem>>, %arg7: memref<64x16xbf16, #tpu.memory_space<vmem>>) attributes {dimension_semantics = [#tpu.dimension_semantics<parallel>], iteration_bounds = array<i64: 1>, scalar_prefetch = 0 : i64, scratch_operands = 0 : i64, tpu.core_type = #tpu.core_type<tc>, window_params = [{transform_indices = @transform_0, window_bounds = array<i64: 64, 150>}, {transform_indices = @transform_1, window_bounds = array<i64: 64, 150>}, {transform_indices = @transform_2, window_bounds = array<i64: 64, 150>}, {transform_indices = @transform_3, window_bounds = array<i64: 64, 150>}, {pipeline_mode = #tpu.pipeline_mode<synchronous>, transform_indices = @transform_4, window_bounds = array<i64: 150, 16>}, {pipeline_mode = #tpu.pipeline_mode<synchronous>, transform_indices = @transform_5, window_bounds = array<i64: 1, 16>}, {transform_indices = @transform_6, window_bounds = array<i64: 64, 16>}]} {
    %c0 = arith.constant 0 : index
    %c0_0 = arith.constant 0 : index
    %0 = vector.load %arg5[%c0, %c0_0] : memref<150x16xbf16, #tpu.memory_space<vmem>>, vector<150x16xbf16>
    %c0_1 = arith.constant 0 : index
    %c0_2 = arith.constant 0 : index
    %1 = vector.load %arg1[%c0_1, %c0_2] : memref<64x150xbf16, #tpu.memory_space<vmem>>, vector<64x150xbf16>
    %cst = arith.constant dense<0.000000e+00> : vector<64x16xf32>
    %2 = tpu.matmul %1, %0, %cst {dimension_numbers = #tpu.dot_dimension_numbers<[1], [0], [0], [1], [0, 0, 1, 1], [], []>} : vector<64x150xbf16>, vector<150x16xbf16>, vector<64x16xf32> -> vector<64x16xf32>
    %c0_3 = arith.constant 0 : index
    %c0_4 = arith.constant 0 : index
    %3 = vector.load %arg2[%c0_3, %c0_4] : memref<64x150xbf16, #tpu.memory_space<vmem>>, vector<64x150xbf16>
    %cst_5 = arith.constant dense<0.000000e+00> : vector<64x16xf32>
    %4 = tpu.matmul %3, %0, %cst_5 {dimension_numbers = #tpu.dot_dimension_numbers<[1], [0], [0], [1], [0, 0, 1, 1], [], []>} : vector<64x150xbf16>, vector<150x16xbf16>, vector<64x16xf32> -> vector<64x16xf32>
    %5 = arith.maximumf %2, %4 : vector<64x16xf32>
    %c0_6 = arith.constant 0 : index
    %c0_7 = arith.constant 0 : index
    %6 = vector.load %arg3[%c0_6, %c0_7] : memref<64x150xbf16, #tpu.memory_space<vmem>>, vector<64x150xbf16>
    %cst_8 = arith.constant dense<0.000000e+00> : vector<64x16xf32>
    %7 = tpu.matmul %6, %0, %cst_8 {dimension_numbers = #tpu.dot_dimension_numbers<[1], [0], [0], [1], [0, 0, 1, 1], [], []>} : vector<64x150xbf16>, vector<150x16xbf16>, vector<64x16xf32> -> vector<64x16xf32>
    %c0_9 = arith.constant 0 : index
    %c0_10 = arith.constant 0 : index
    %8 = vector.load %arg4[%c0_9, %c0_10] : memref<64x150xbf16, #tpu.memory_space<vmem>>, vector<64x150xbf16>
    %cst_11 = arith.constant dense<0.000000e+00> : vector<64x16xf32>
    %9 = tpu.matmul %8, %0, %cst_11 {dimension_numbers = #tpu.dot_dimension_numbers<[1], [0], [0], [1], [0, 0, 1, 1], [], []>} : vector<64x150xbf16>, vector<150x16xbf16>, vector<64x16xf32> -> vector<64x16xf32>
    %10 = arith.maximumf %7, %9 : vector<64x16xf32>
    %11 = arith.maximumf %5, %10 : vector<64x16xf32>
    %c0_12 = arith.constant 0 : index
    %c0_13 = arith.constant 0 : index
    %12 = vector.load %arg6[%c0_12, %c0_13] : memref<1x16xf32, #tpu.memory_space<vmem>>, vector<1x16xf32>
    %13 = vector.broadcast %12 : vector<1x16xf32> to vector<64x16xf32>
    %14 = arith.addf %11, %13 : vector<64x16xf32>
    %cst_14 = arith.constant 0.000000e+00 : f32
    %15 = vector.broadcast %cst_14 : f32 to vector<64x16xf32>
    %16 = arith.maximumf %14, %15 : vector<64x16xf32>
    %17 = arith.truncf %16 : vector<64x16xf32> to vector<64x16xbf16>
    %c0_15 = arith.constant 0 : index
    %c0_16 = arith.constant 0 : index
    %18 = vector.load %arg7[%c0_15, %c0_16] : memref<64x16xbf16, #tpu.memory_space<vmem>>, vector<64x16xbf16>
    tpu.vector_store %arg7[%c0_15, %c0_16], %17 {strides = array<i32>} : memref<64x16xbf16, #tpu.memory_space<vmem>>, vector<64x16xbf16>,
    return
  }
  func.func @transform_0(%arg0: i32) -> (i32, i32) {
    %c0_i32 = arith.constant 0 : i32
    %c0_i32_0 = arith.constant 0 : i32
    return %arg0, %c0_i32 : i32, i32
  }
  func.func @transform_1(%arg0: i32) -> (i32, i32) {
    %c0_i32 = arith.constant 0 : i32
    %c0_i32_0 = arith.constant 0 : i32
    return %arg0, %c0_i32 : i32, i32
  }
  func.func @transform_2(%arg0: i32) -> (i32, i32) {
    %c0_i32 = arith.constant 0 : i32
    %c0_i32_0 = arith.constant 0 : i32
    return %arg0, %c0_i32 : i32, i32
  }
  func.func @transform_3(%arg0: i32) -> (i32, i32) {
    %c0_i32 = arith.constant 0 : i32
    %c0_i32_0 = arith.constant 0 : i32
    return %arg0, %c0_i32 : i32, i32
  }
  func.func @transform_4(%arg0: i32) -> (i32, i32) {
    %c0_i32 = arith.constant 0 : i32
    %c0_i32_0 = arith.constant 0 : i32
    %c0_i32_1 = arith.constant 0 : i32
    return %c0_i32, %c0_i32_0 : i32, i32
  }
  func.func @transform_5(%arg0: i32) -> (i32, i32) {
    %c0_i32 = arith.constant 0 : i32
    %c0_i32_0 = arith.constant 0 : i32
    %c0_i32_1 = arith.constant 0 : i32
    return %c0_i32, %c0_i32_0 : i32, i32
  }
  func.func @transform_6(%arg0: i32) -> (i32, i32) {
    %c0_i32 = arith.constant 0 : i32
    %c0_i32_0 = arith.constant 0 : i32
    return %arg0, %c0_i32 : i32, i32
  }
}

module attributes {stable_mosaic.version = 11 : i64} {
  func.func @_head_kernel(%arg0: i32, %arg1: memref<16x400xbf16, #tpu.memory_space<vmem>>, %arg2: memref<400x120xbf16, #tpu.memory_space<vmem>>, %arg3: memref<1x120xf32, #tpu.memory_space<vmem>>, %arg4: memref<120x84xbf16, #tpu.memory_space<vmem>>, %arg5: memref<1x84xf32, #tpu.memory_space<vmem>>, %arg6: memref<84x10xbf16, #tpu.memory_space<vmem>>, %arg7: memref<1x10xf32, #tpu.memory_space<vmem>>, %arg8: memref<16x10xf32, #tpu.memory_space<vmem>>) attributes {dimension_semantics = [#tpu.dimension_semantics<parallel>], iteration_bounds = array<i64: 1>, scalar_prefetch = 0 : i64, scratch_operands = 0 : i64, tpu.core_type = #tpu.core_type<tc>, window_params = [{transform_indices = @transform_0, window_bounds = array<i64: 16, 400>}, {pipeline_mode = #tpu.pipeline_mode<synchronous>, transform_indices = @transform_1, window_bounds = array<i64: 400, 120>}, {pipeline_mode = #tpu.pipeline_mode<synchronous>, transform_indices = @transform_2, window_bounds = array<i64: 1, 120>}, {pipeline_mode = #tpu.pipeline_mode<synchronous>, transform_indices = @transform_3, window_bounds = array<i64: 120, 84>}, {pipeline_mode = #tpu.pipeline_mode<synchronous>, transform_indices = @transform_4, window_bounds = array<i64: 1, 84>}, {pipeline_mode = #tpu.pipeline_mode<synchronous>, transform_indices = @transform_5, window_bounds = array<i64: 84, 10>}, {pipeline_mode = #tpu.pipeline_mode<synchronous>, transform_indices = @transform_6, window_bounds = array<i64: 1, 10>}, {transform_indices = @transform_7, window_bounds = array<i64: 16, 10>}]} {
    %c0 = arith.constant 0 : index
    %c0_0 = arith.constant 0 : index
    %0 = vector.load %arg1[%c0, %c0_0] : memref<16x400xbf16, #tpu.memory_space<vmem>>, vector<16x400xbf16>
    %c0_1 = arith.constant 0 : index
    %c0_2 = arith.constant 0 : index
    %1 = vector.load %arg2[%c0_1, %c0_2] : memref<400x120xbf16, #tpu.memory_space<vmem>>, vector<400x120xbf16>
    %cst = arith.constant dense<0.000000e+00> : vector<16x120xf32>
    %2 = tpu.matmul %0, %1, %cst {dimension_numbers = #tpu.dot_dimension_numbers<[1], [0], [0], [1], [0, 0, 1, 1], [], []>} : vector<16x400xbf16>, vector<400x120xbf16>, vector<16x120xf32> -> vector<16x120xf32>
    %c0_3 = arith.constant 0 : index
    %c0_4 = arith.constant 0 : index
    %3 = vector.load %arg3[%c0_3, %c0_4] : memref<1x120xf32, #tpu.memory_space<vmem>>, vector<1x120xf32>
    %4 = vector.broadcast %3 : vector<1x120xf32> to vector<16x120xf32>
    %5 = arith.addf %2, %4 : vector<16x120xf32>
    %cst_5 = arith.constant 0.000000e+00 : f32
    %6 = vector.broadcast %cst_5 : f32 to vector<16x120xf32>
    %7 = arith.maximumf %5, %6 : vector<16x120xf32>
    %8 = arith.truncf %7 : vector<16x120xf32> to vector<16x120xbf16>
    %c0_6 = arith.constant 0 : index
    %c0_7 = arith.constant 0 : index
    %9 = vector.load %arg4[%c0_6, %c0_7] : memref<120x84xbf16, #tpu.memory_space<vmem>>, vector<120x84xbf16>
    %cst_8 = arith.constant dense<0.000000e+00> : vector<16x84xf32>
    %10 = tpu.matmul %8, %9, %cst_8 {dimension_numbers = #tpu.dot_dimension_numbers<[1], [0], [0], [1], [0, 0, 1, 1], [], []>} : vector<16x120xbf16>, vector<120x84xbf16>, vector<16x84xf32> -> vector<16x84xf32>
    %c0_9 = arith.constant 0 : index
    %c0_10 = arith.constant 0 : index
    %11 = vector.load %arg5[%c0_9, %c0_10] : memref<1x84xf32, #tpu.memory_space<vmem>>, vector<1x84xf32>
    %12 = vector.broadcast %11 : vector<1x84xf32> to vector<16x84xf32>
    %13 = arith.addf %10, %12 : vector<16x84xf32>
    %cst_11 = arith.constant 0.000000e+00 : f32
    %14 = vector.broadcast %cst_11 : f32 to vector<16x84xf32>
    %15 = arith.maximumf %13, %14 : vector<16x84xf32>
    %16 = arith.truncf %15 : vector<16x84xf32> to vector<16x84xbf16>
    %c0_12 = arith.constant 0 : index
    %c0_13 = arith.constant 0 : index
    %17 = vector.load %arg6[%c0_12, %c0_13] : memref<84x10xbf16, #tpu.memory_space<vmem>>, vector<84x10xbf16>
    %cst_14 = arith.constant dense<0.000000e+00> : vector<16x10xf32>
    %18 = tpu.matmul %16, %17, %cst_14 {dimension_numbers = #tpu.dot_dimension_numbers<[1], [0], [0], [1], [0, 0, 1, 1], [], []>} : vector<16x84xbf16>, vector<84x10xbf16>, vector<16x10xf32> -> vector<16x10xf32>
    %c0_15 = arith.constant 0 : index
    %c0_16 = arith.constant 0 : index
    %19 = vector.load %arg7[%c0_15, %c0_16] : memref<1x10xf32, #tpu.memory_space<vmem>>, vector<1x10xf32>
    %20 = vector.broadcast %19 : vector<1x10xf32> to vector<16x10xf32>
    %21 = arith.addf %18, %20 : vector<16x10xf32>
    %cst_17 = arith.constant dense<0xFF800000> : vector<16xf32>
    %22 = vector.multi_reduction <maximumf>, %21, %cst_17 [1] : vector<16x10xf32> to vector<16xf32>
    %23 = vector.shape_cast %22 : vector<16xf32> to vector<16x1xf32>
    %24 = vector.broadcast %23 : vector<16x1xf32> to vector<16x10xf32>
    %25 = arith.subf %21, %24 : vector<16x10xf32>
    %26 = math.exp %25 : vector<16x10xf32>
    %cst_18 = arith.constant dense<0.000000e+00> : vector<16xf32>
    %27 = vector.multi_reduction <add>, %26, %cst_18 [1] : vector<16x10xf32> to vector<16xf32>
    %28 = vector.shape_cast %27 : vector<16xf32> to vector<16x1xf32>
    %29 = math.log %28 : vector<16x1xf32>
    %30 = vector.broadcast %29 : vector<16x1xf32> to vector<16x10xf32>
    %31 = arith.subf %25, %30 : vector<16x10xf32>
    %c0_19 = arith.constant 0 : index
    %c0_20 = arith.constant 0 : index
    %32 = vector.load %arg8[%c0_19, %c0_20] : memref<16x10xf32, #tpu.memory_space<vmem>>, vector<16x10xf32>
    tpu.vector_store %arg8[%c0_19, %c0_20], %31 {strides = array<i32>} : memref<16x10xf32, #tpu.memory_space<vmem>>, vector<16x10xf32>,
    return
  }
  func.func @transform_0(%arg0: i32) -> (i32, i32) {
    %c0_i32 = arith.constant 0 : i32
    %c0_i32_0 = arith.constant 0 : i32
    return %arg0, %c0_i32 : i32, i32
  }
  func.func @transform_1(%arg0: i32) -> (i32, i32) {
    %c0_i32 = arith.constant 0 : i32
    %c0_i32_0 = arith.constant 0 : i32
    %c0_i32_1 = arith.constant 0 : i32
    return %c0_i32, %c0_i32_0 : i32, i32
  }
  func.func @transform_2(%arg0: i32) -> (i32, i32) {
    %c0_i32 = arith.constant 0 : i32
    %c0_i32_0 = arith.constant 0 : i32
    %c0_i32_1 = arith.constant 0 : i32
    return %c0_i32, %c0_i32_0 : i32, i32
  }
  func.func @transform_3(%arg0: i32) -> (i32, i32) {
    %c0_i32 = arith.constant 0 : i32
    %c0_i32_0 = arith.constant 0 : i32
    %c0_i32_1 = arith.constant 0 : i32
    return %c0_i32, %c0_i32_0 : i32, i32
  }
  func.func @transform_4(%arg0: i32) -> (i32, i32) {
    %c0_i32 = arith.constant 0 : i32
    %c0_i32_0 = arith.constant 0 : i32
    %c0_i32_1 = arith.constant 0 : i32
    return %c0_i32, %c0_i32_0 : i32, i32
  }
  func.func @transform_5(%arg0: i32) -> (i32, i32) {
    %c0_i32 = arith.constant 0 : i32
    %c0_i32_0 = arith.constant 0 : i32
    %c0_i32_1 = arith.constant 0 : i32
    return %c0_i32, %c0_i32_0 : i32, i32
  }
  func.func @transform_6(%arg0: i32) -> (i32, i32) {
    %c0_i32 = arith.constant 0 : i32
    %c0_i32_0 = arith.constant 0 : i32
    %c0_i32_1 = arith.constant 0 : i32
    return %c0_i32, %c0_i32_0 : i32, i32
  }
  func.func @transform_7(%arg0: i32) -> (i32, i32) {
    %c0_i32 = arith.constant 0 : i32
    %c0_i32_0 = arith.constant 0 : i32
    return %arg0, %c0_i32 : i32, i32
  }
}

</mosaic_0001>

<bundles_post_ra>
// kernel: forward.3
= control target key start
LH: loop header
LB: loop body
LE: loop exit
PB: predicated region body
PF: predicated region fallthrough
CT: control target
= control target key end

     0   :  { %vm290_vm0 = vcmask 1043456   ;;  %vm291_vm1 = vcmask 1044480   ;;  %v4787_v0 = vmov 0.0   ;;  %v3424_v2 = vmov 65535   ;;  %s4780_s4 = inlined_call_operand.vmem [shape: bf16[25,6], index: 4, kind: input, shape index: {}]   ;;  %s4781_s0 = inlined_call_operand.vmem [shape: bf16[400,25], index: 0, kind: input, shape index: {}]   ;;  %s4782_s1 = inlined_call_operand.vmem [shape: bf16[400,25], index: 1, kind: input, shape index: {}]   ;;  %s4783_s2 = inlined_call_operand.vmem [shape: bf16[400,25], index: 2, kind: input, shape index: {}]   ;;  %s4784_s3 = inlined_call_operand.vmem [shape: bf16[400,25], index: 3, kind: input, shape index: {}]   ;;  %s4785_s5 = inlined_call_operand.vmem [shape: f32[1,6], index: 5, kind: input, shape index: {}]   ;;  %s4786_s6 = inlined_call_operand.vmem [shape: bf16[400,6], index: 6, kind: output, shape index: {}]  }
   0x1   :  { %2902 = vmatprep.subr.bf16.mxu0 %v4787_v0  ;;  %3006 = vmatprep.subr.bf16.mxu1 %v4787_v0  ;;  %v3321_v1 = vld [vmem:[%s4780_s4] sm:$0xff]   ;;  %v292_v3 = vsel %vm290_vm0, 4294967295, %v3424_v2  ;;  %v3322_v4 = vld [vmem:[%s4780_s4 + $0x8] sm:$0x1f]   ;;  %vm3425_vm2 = vmmov 0   ;;  %vm214_vm3 = vcmask 203776  }
   0x2   :  { %2903 = vmatpush3.bf16.msra.mxu0 %v3321_v1  ;;  %3007 = vmatpush3.bf16.msra.mxu1 %v3321_v1  ;;  %v293_v5 = vsel %vm291_vm1, %v292_v3, 0  ;;  %v3323_v7 = vld [vmem:[%s4781_s0] sm:$0xff]   ;;  %v3325_v9 = vld [vmem:[%s4781_s0 + $0x8] sm:$0xff]   ;;  %v3327_v11 = vld [vmem:[%s4781_s0 + $0x10] sm:$0xff]   ;;  %vm2436_vm4 = vcmask 44032  }
   0x3   :  { %2904 = vmatprep.subr.bf16.mxu0 %v4787_v0  ;;  %3008 = vmatprep.subr.bf16.mxu1 %v4787_v0  ;;  %v295_v6 = vand.u32 %v3322_v4, %v293_v5  ;;  %v3324_v8 = vld [vmem:[%s4782_s1] sm:$0xff]   ;;  %v3326_v10 = vld [vmem:[%s4782_s1 + $0x8] sm:$0xff]   ;;  %v3328_v12 = vld [vmem:[%s4782_s1 + $0x10] sm:$0xff]  }
   0x4   :  { %2906 = vmatprep.mubr.msk.bf16.mxu0 %vm3425_vm2, %v4787_v0  ;;  %3010 = vmatprep.mubr.msk.bf16.mxu1 %vm3425_vm2, %v4787_v0  ;;  %v3329_v13 = vld [vmem:[%s4781_s0 + $0x18] sm:$0xff]   ;;  %v3331_v15 = vld [vmem:[%s4781_s0 + $0x20] sm:$0xff]   ;;  %v3333_v17 = vld [vmem:[%s4781_s0 + $0x28] sm:$0xff]  }
   0x5   :  { %v3330_v14 = vld [vmem:[%s4782_s1 + $0x18] sm:$0xff]   ;;  %v3332_v16 = vld [vmem:[%s4782_s1 + $0x20] sm:$0xff]   ;;  %v3334_v18 = vld [vmem:[%s4782_s1 + $0x28] sm:$0xff]  }
   0x6   :  { %2905 = vmatpush3.bf16.msra.mxu0 %v295_v6  ;;  %3009 = vmatpush3.bf16.msra.mxu1 %v295_v6  ;;  %v3335_v19 = vld [vmem:[%s4781_s0 + $0x30] sm:$0xff]   ;;  %v3337_v21 = vld [vmem:[%s4781_s0 + $0x38] sm:$0xff]   ;;  %v3339_v23 = vld [vmem:[%s4781_s0 + $0x40] sm:$0xff]  }
   0x7   :  { %3110 = vmatprep.subr.bf16.mxu0 %v4787_v0  ;;  %3214 = vmatprep.subr.bf16.mxu1 %v4787_v0  ;;  %v3336_v20 = vld [vmem:[%s4782_s1 + $0x30] sm:$0xff]   ;;  %v3338_v22 = vld [vmem:[%s4782_s1 + $0x38] sm:$0xff]   ;;  %v3340_v24 = vld [vmem:[%s4782_s1 + $0x40] sm:$0xff]  }
   0x8   :  { %v3341_v25 = vld [vmem:[%s4781_s0 + $0x48] sm:$0xff]   ;;  %v3343_v27 = vld [vmem:[%s4781_s0 + $0x50] sm:$0xff]   ;;  %v3345_v29 = vld [vmem:[%s4781_s0 + $0x58] sm:$0xff]  }
   0x9   :  { %2907 = vmatmul.mubr.msk.bf16.vlgmr.msra.gmra.mrb[0].mxu0 %vm214_vm3, %v3323_v7  ;;  %3011 = vmatmul.mubr.msk.bf16.vlgmr.msra.gmra.mrb[0].mxu1 %vm214_vm3, %v3324_v8  ;;  %v3342_v26 = vld [vmem:[%s4782_s1 + $0x48] sm:$0xff]   ;;  %v3344_v28 = vld [vmem:[%s4782_s1 + $0x50] sm:$0xff]   ;;  %v3346_v30 = vld [vmem:[%s4782_s1 + $0x58] sm:$0xff]  }
   0xa   :  { %3111 = vmatpush3.bf16.msra.mxu0 %v3321_v1  ;;  %3215 = vmatpush3.bf16.msra.mxu1 %v3321_v1  ;;  %v3347_v31 = vld [vmem:[%s4781_s0 + $0x60] sm:$0xff]   ;;  %v3349_v33 = vld [vmem:[%s4781_s0 + $0x68] sm:$0xff]   ;;  %v3351_v35 = vld [vmem:[%s4781_s0 + $0x70] sm:$0xff]  }
   0xb   :  { %2910 = vmatprep.mubr.msk.bf16.mxu0 %vm3425_vm2, %v4787_v0  ;;  %3014 = vmatprep.mubr.msk.bf16.mxu1 %vm3425_vm2, %v4787_v0  ;;  %v3348_v32 = vld [vmem:[%s4782_s1 + $0x60] sm:$0xff]   ;;  %v3350_v34 = vld [vmem:[%s4782_s1 + $0x68] sm:$0xff]   ;;  %v3352_v36 = vld [vmem:[%s4782_s1 + $0x70] sm:$0xff]  }
   0xc   :  { %3112 = vmatprep.subr.bf16.mxu0 %v4787_v0  ;;  %3216 = vmatprep.subr.bf16.mxu1 %v4787_v0  ;;  %v3353_v37 = vld [vmem:[%s4781_s0 + $0x78] sm:$0xff]   ;;  %v3355_v39 = vld [vmem:[%s4781_s0 + $0x80] sm:$0xff]   ;;  %v3357_v41 = vld [vmem:[%s4781_s0 + $0x88] sm:$0xff]  }
   0xd   :  { %v3354_v38 = vld [vmem:[%s4782_s1 + $0x78] sm:$0xff]   ;;  %v3356_v40 = vld [vmem:[%s4782_s1 + $0x80] sm:$0xff]   ;;  %v3358_v42 = vld [vmem:[%s4782_s1 + $0x88] sm:$0xff]  }
   0xe   :  { %3113 = vmatpush3.bf16.msra.mxu0 %v295_v6  ;;  %3217 = vmatpush3.bf16.msra.mxu1 %v295_v6  ;;  %v3359_v43 = vld [vmem:[%s4781_s0 + $0x90] sm:$0xff]   ;;  %v3361_v45 = vld [vmem:[%s4781_s0 + $0x98] sm:$0xff]   ;;  %v3363_v47 = vld [vmem:[%s4781_s0 + $0xa0] sm:$0xff]  }
   0xf   :  { %v3360_v44 = vld [vmem:[%s4782_s1 + $0x90] sm:$0xff]   ;;  %v3362_v46 = vld [vmem:[%s4782_s1 + $0x98] sm:$0xff]   ;;  %v3364_v48 = vld [vmem:[%s4782_s1 + $0xa0] sm:$0xff]  }
  0x10   :  { %v3365_v49 = vld [vmem:[%s4781_s0 + $0xa8] sm:$0xff]   ;;  %v3367_v51 = vld [vmem:[%s4781_s0 + $0xb0] sm:$0xff]   ;;  %v3369_v53 = vld [vmem:[%s4781_s0 + $0xb8] sm:$0xff]  }
  0x11   :  { %2911 = vmatmul.mubr.msk.bf16.gmra.mrb[4].mxu0 %vm214_vm3, %v3325_v9  ;;  %3015 = vmatmul.mubr.msk.bf16.gmra.mrb[4].mxu1 %vm214_vm3, %v3326_v10  ;;  %v3366_v50 = vld [vmem:[%s4782_s1 + $0xa8] sm:$0xff]   ;;  %v3368_v52 = vld [vmem:[%s4782_s1 + $0xb0] sm:$0xff]   ;;  %v3370_v54 = vld [vmem:[%s4782_s1 + $0xb8] sm:$0xff]  }
  0x12   :  { %2914 = vmatprep.mubr.msk.bf16.mxu0 %vm3425_vm2, %v4787_v0  ;;  %3018 = vmatprep.mubr.msk.bf16.mxu1 %vm3425_vm2, %v4787_v0  ;;  %v3371_v55 = vld [vmem:[%s4781_s0 + $0xc0] sm:$0xff]   ;;  %v3375_v59 = vld [vmem:[%s4783_s2 + $0x8] sm:$0xff]   ;;  %v3377_v3 = vld [vmem:[%s4783_s2 + $0x10] sm:$0xff]  }
  0x13   :  { %v3372_v56 = vld [vmem:[%s4782_s1 + $0xc0] sm:$0xff]   ;;  %v3376_v60 = vld [vmem:[%s4784_s3 + $0x8] sm:$0xff]   ;;  %v3378_v4 = vld [vmem:[%s4784_s3 + $0x10] sm:$0xff]  }
  0x14   :  { %v3373_v57 = vld [vmem:[%s4783_s2] sm:$0xff]  }
  0x15   :  { %v3374_v58 = vld [vmem:[%s4784_s3] sm:$0xff]  }
  0x19   :  { %2915 = vmatmul.mubr.msk.bf16.gmra.mrb[8].mxu0 %vm214_vm3, %v3327_v11  ;;  %3019 = vmatmul.mubr.msk.bf16.gmra.mrb[8].mxu1 %vm214_vm3, %v3328_v12 }
  0x1a   :  { %2918 = vmatprep.mubr.msk.bf16.mxu0 %vm3425_vm2, %v4787_v0  ;;  %3022 = vmatprep.mubr.msk.bf16.mxu1 %vm3425_vm2, %v4787_v0 }
  0x21   :  { %2919 = vmatmul.mubr.msk.bf16.gmra.mrb[12].mxu0 %vm214_vm3, %v3329_v13  ;;  %3023 = vmatmul.mubr.msk.bf16.gmra.mrb[12].mxu1 %vm214_vm3, %v3330_v14 }
  0x22   :  { %2922 = vmatprep.mubr.msk.bf16.mxu0 %vm3425_vm2, %v4787_v0  ;;  %3026 = vmatprep.mubr.msk.bf16.mxu1 %vm3425_vm2, %v4787_v0 }
  0x29   :  { %2923 = vmatmul.mubr.msk.bf16.gmra.mrb[16].mxu0 %vm214_vm3, %v3331_v15  ;;  %3027 = vmatmul.mubr.msk.bf16.gmra.mrb[16].mxu1 %vm214_vm3, %v3332_v16  ;;  %v3379_v15 = vld [vmem:[%s4783_s2 + $0x18] sm:$0xff]  }
  0x2a   :  { %2926 = vmatprep.mubr.msk.bf16.mxu0 %vm3425_vm2, %v4787_v0  ;;  %3030 = vmatprep.mubr.msk.bf16.mxu1 %vm3425_vm2, %v4787_v0  ;;  %v3380_v16 = vld [vmem:[%s4784_s3 + $0x18] sm:$0xff]  }
  0x31   :  { %2927 = vmatmul.mubr.msk.bf16.gmra.mrb[20].mxu0 %vm214_vm3, %v3333_v17  ;;  %3031 = vmatmul.mubr.msk.bf16.gmra.mrb[20].mxu1 %vm214_vm3, %v3334_v18 }
  0x32   :  { %2930 = vmatprep.mubr.msk.bf16.mxu0 %vm3425_vm2, %v4787_v0  ;;  %3034 = vmatprep.mubr.msk.bf16.mxu1 %vm3425_vm2, %v4787_v0 }
  0x39   :  { %2931 = vmatmul.mubr.msk.bf16.gmra.mrb[24].mxu0 %vm214_vm3, %v3335_v19  ;;  %3035 = vmatmul.mubr.msk.bf16.gmra.mrb[24].mxu1 %vm214_vm3, %v3336_v20 }
  0x3a   :  { %2934 = vmatprep.mubr.msk.bf16.mxu0 %vm3425_vm2, %v4787_v0  ;;  %3038 = vmatprep.mubr.msk.bf16.mxu1 %vm3425_vm2, %v4787_v0 }
  0x41   :  { %2935 = vmatmul.mubr.msk.bf16.gmra.mrb[28].mxu0 %vm214_vm3, %v3337_v21  ;;  %3039 = vmatmul.mubr.msk.bf16.gmra.mrb[28].mxu1 %vm214_vm3, %v3338_v22 }
  0x42   :  { %2938 = vmatprep.mubr.msk.bf16.mxu0 %vm3425_vm2, %v4787_v0  ;;  %3042 = vmatprep.mubr.msk.bf16.mxu1 %vm3425_vm2, %v4787_v0 }
  0x49   :  { %2939 = vmatmul.mubr.msk.bf16.gmra.mrb[32].mxu0 %vm214_vm3, %v3339_v23  ;;  %3043 = vmatmul.mubr.msk.bf16.gmra.mrb[32].mxu1 %vm214_vm3, %v3340_v24 }
  0x4a   :  { %2942 = vmatprep.mubr.msk.bf16.mxu0 %vm3425_vm2, %v4787_v0  ;;  %3046 = vmatprep.mubr.msk.bf16.mxu1 %vm3425_vm2, %v4787_v0 }
  0x51   :  { %2943 = vmatmul.mubr.msk.bf16.gmra.mrb[36].mxu0 %vm214_vm3, %v3341_v25  ;;  %3047 = vmatmul.mubr.msk.bf16.gmra.mrb[36].mxu1 %vm214_vm3, %v3342_v26 }
  0x52   :  { %2946 = vmatprep.mubr.msk.bf16.mxu0 %vm3425_vm2, %v4787_v0  ;;  %3050 = vmatprep.mubr.msk.bf16.mxu1 %vm3425_vm2, %v4787_v0 }
  0x59   :  { %2947 = vmatmul.mubr.msk.bf16.gmra.mrb[40].mxu0 %vm214_vm3, %v3343_v27  ;;  %3051 = vmatmul.mubr.msk.bf16.gmra.mrb[40].mxu1 %vm214_vm3, %v3344_v28  ;;  %v3381_v27 = vld [vmem:[%s4783_s2 + $0x20] sm:$0xff]  }
  0x5a   :  { %2950 = vmatprep.mubr.msk.bf16.mxu0 %vm3425_vm2, %v4787_v0  ;;  %3054 = vmatprep.mubr.msk.bf16.mxu1 %vm3425_vm2, %v4787_v0  ;;  %v3382_v28 = vld [vmem:[%s4784_s3 + $0x20] sm:$0xff]  }
  0x61   :  { %2951 = vmatmul.mubr.msk.bf16.gmra.mrb[44].mxu0 %vm214_vm3, %v3345_v29  ;;  %3055 = vmatmul.mubr.msk.bf16.gmra.mrb[44].mxu1 %vm214_vm3, %v3346_v30 }
  0x62   :  { %2954 = vmatprep.mubr.msk.bf16.mxu0 %vm3425_vm2, %v4787_v0  ;;  %3058 = vmatprep.mubr.msk.bf16.mxu1 %vm3425_vm2, %v4787_v0 }
  0x69   :  { %2955 = vmatmul.mubr.msk.bf16.gmra.mrb[48].mxu0 %vm214_vm3, %v3347_v31  ;;  %3059 = vmatmul.mubr.msk.bf16.gmra.mrb[48].mxu1 %vm214_vm3, %v3348_v32 }
  0x6a   :  { %2958 = vmatprep.mubr.msk.bf16.mxu0 %vm3425_vm2, %v4787_v0  ;;  %3062 = vmatprep.mubr.msk.bf16.mxu1 %vm3425_vm2, %v4787_v0 }
  0x71   :  { %2959 = vmatmul.mubr.msk.bf16.gmra.mrb[52].mxu0 %vm214_vm3, %v3349_v33  ;;  %3063 = vmatmul.mubr.msk.bf16.gmra.mrb[52].mxu1 %vm214_vm3, %v3350_v34 }
  0x72   :  { %2962 = vmatprep.mubr.msk.bf16.mxu0 %vm3425_vm2, %v4787_v0  ;;  %3066 = vmatprep.mubr.msk.bf16.mxu1 %vm3425_vm2, %v4787_v0 }
  0x79   :  { %2963 = vmatmul.mubr.msk.bf16.gmra.mrb[56].mxu0 %vm214_vm3, %v3351_v35  ;;  %3067 = vmatmul.mubr.msk.bf16.gmra.mrb[56].mxu1 %vm214_vm3, %v3352_v36 }
  0x7a   :  { %2966 = vmatprep.mubr.msk.bf16.mxu0 %vm3425_vm2, %v4787_v0  ;;  %3070 = vmatprep.mubr.msk.bf16.mxu1 %vm3425_vm2, %v4787_v0 }
  0x81   :  { %2967 = vmatmul.mubr.msk.bf16.gmra.mrb[60].mxu0 %vm214_vm3, %v3353_v37  ;;  %3071 = vmatmul.mubr.msk.bf16.gmra.mrb[60].mxu1 %vm214_vm3, %v3354_v38 }
  0x82   :  { %2970 = vmatprep.mubr.msk.bf16.mxu0 %vm3425_vm2, %v4787_v0  ;;  %3074 = vmatprep.mubr.msk.bf16.mxu1 %vm3425_vm2, %v4787_v0 }
  0x89   :  { %2971 = vmatmul.mubr.msk.bf16.gmra.mrb[64].mxu0 %vm214_vm3, %v3355_v39  ;;  %3075 = vmatmul.mubr.msk.bf16.gmra.mrb[64].mxu1 %vm214_vm3, %v3356_v40  ;;  %v3383_v39 = vld [vmem:[%s4783_s2 + $0x28] sm:$0xff]  }
  0x8a   :  { %2974 = vmatprep.mubr.msk.bf16.mxu0 %vm3425_vm2, %v4787_v0  ;;  %3078 = vmatprep.mubr.msk.bf16.mxu1 %vm3425_vm2, %v4787_v0  ;;  %v3384_v40 = vld [vmem:[%s4784_s3 + $0x28] sm:$0xff]  }
  0x91   :  { %2975 = vmatmul.mubr.msk.bf16.gmra.mrb[68].mxu0 %vm214_vm3, %v3357_v41  ;;  %3079 = vmatmul.mubr.msk.bf16.gmra.mrb[68].mxu1 %vm214_vm3, %v3358_v42 }
  0x92   :  { %2978 = vmatprep.mubr.msk.bf16.mxu0 %vm3425_vm2, %v4787_v0  ;;  %3082 = vmatprep.mubr.msk.bf16.mxu1 %vm3425_vm2, %v4787_v0 }
  0x99   :  { %2979 = vmatmul.mubr.msk.bf16.gmra.mrb[72].mxu0 %vm214_vm3, %v3359_v43  ;;  %3083 = vmatmul.mubr.msk.bf16.gmra.mrb[72].mxu1 %vm214_vm3, %v3360_v44 }
  0x9a   :  { %2982 = vmatprep.mubr.msk.bf16.mxu0 %vm3425_vm2, %v4787_v0  ;;  %3086 = vmatprep.mubr.msk.bf16.mxu1 %vm3425_vm2, %v4787_v0 }
  0xa1   :  { %2983 = vmatmul.mubr.msk.bf16.gmra.mrb[76].mxu0 %vm214_vm3, %v3361_v45  ;;  %3087 = vmatmul.mubr.msk.bf16.gmra.mrb[76].mxu1 %vm214_vm3, %v3362_v46 }
  0xa2   :  { %2986 = vmatprep.mubr.msk.bf16.mxu0 %vm3425_vm2, %v4787_v0  ;;  %3090 = vmatprep.mubr.msk.bf16.mxu1 %vm3425_vm2, %v4787_v0 }
  0xa9   :  { %2987 = vmatmul.mubr.msk.bf16.gmra.mrb[80].mxu0 %vm214_vm3, %v3363_v47  ;;  %3091 = vmatmul.mubr.msk.bf16.gmra.mrb[80].mxu1 %vm214_vm3, %v3364_v48 }
  0xaa   :  { %2990 = vmatprep.mubr.msk.bf16.mxu0 %vm3425_vm2, %v4787_v0  ;;  %3094 = vmatprep.mubr.msk.bf16.mxu1 %vm3425_vm2, %v4787_v0 }
  0xb1   :  { %2991 = vmatmul.mubr.msk.bf16.gmra.mrb[84].mxu0 %vm214_vm3, %v3365_v49  ;;  %3095 = vmatmul.mubr.msk.bf16.gmra.mrb[84].mxu1 %vm214_vm3, %v3366_v50 }
  0xb2   :  { %2994 = vmatprep.mubr.msk.bf16.mxu0 %vm3425_vm2, %v4787_v0  ;;  %3098 = vmatprep.mubr.msk.bf16.mxu1 %vm3425_vm2, %v4787_v0 }
  0xb9   :  { %2995 = vmatmul.mubr.msk.bf16.gmra.mrb[88].mxu0 %vm214_vm3, %v3367_v51  ;;  %3099 = vmatmul.mubr.msk.bf16.gmra.mrb[88].mxu1 %vm214_vm3, %v3368_v52  ;;  %v3385_v51 = vld [vmem:[%s4783_s2 + $0x30] sm:$0xff]  }
  0xba   :  { %2998 = vmatprep.mubr.msk.bf16.mxu0 %vm3425_vm2, %v4787_v0  ;;  %3102 = vmatprep.mubr.msk.bf16.mxu1 %vm3425_vm2, %v4787_v0  ;;  %v3386_v52 = vld [vmem:[%s4784_s3 + $0x30] sm:$0xff]  }
  0xc1   :  { %2999 = vmatmul.mubr.msk.bf16.gmra.mrb[92].mxu0 %vm214_vm3, %v3369_v53  ;;  %3103 = vmatmul.mubr.msk.bf16.gmra.mrb[92].mxu1 %vm214_vm3, %v3370_v54 }
  0xc2   :  { %3002 = vmatprep.mubr.msk.bf16.mxu0 %vm3425_vm2, %v4787_v0  ;;  %3106 = vmatprep.mubr.msk.bf16.mxu1 %vm3425_vm2, %v4787_v0 }
  0xc9   :  { %3003 = vmatmul.mubr.msk.bf16.gmra.mrb[96].mxu0 %vm214_vm3, %v3371_v55  ;;  %3107 = vmatmul.mubr.msk.bf16.gmra.mrb[96].mxu1 %vm214_vm3, %v3372_v56 }
  0xca   :  { %3114 = vmatprep.mubr.msk.bf16.mxu0 %vm3425_vm2, %v4787_v0  ;;  %3218 = vmatprep.mubr.msk.bf16.mxu1 %vm3425_vm2, %v4787_v0 }
  0xd1   :  { %3115 = vmatmul.mubr.msk.bf16.vlgmr.msra.gmra.mrb[100].mxu0 %vm214_vm3, %v3373_v57  ;;  %3219 = vmatmul.mubr.msk.bf16.vlgmr.msra.gmra.mrb[100].mxu1 %vm214_vm3, %v3374_v58 }
  0xd2   :  { %3118 = vmatprep.mubr.msk.bf16.mxu0 %vm3425_vm2, %v4787_v0  ;;  %3222 = vmatprep.mubr.msk.bf16.mxu1 %vm3425_vm2, %v4787_v0 }
  0xd9   :  { %3119 = vmatmul.mubr.msk.bf16.gmra.mrb[104].mxu0 %vm214_vm3, %v3375_v59  ;;  %3223 = vmatmul.mubr.msk.bf16.gmra.mrb[104].mxu1 %vm214_vm3, %v3376_v60 }
  0xda   :  { %3122 = vmatprep.mubr.msk.bf16.mxu0 %vm3425_vm2, %v4787_v0  ;;  %3226 = vmatprep.mubr.msk.bf16.mxu1 %vm3425_vm2, %v4787_v0 }
  0xdc   :  { %v3803_v61 = vpop.f32.mrb[0].mxu0  ;;  %v3805_v62 = vpop.f32.mrb[0].mxu1 }
  0xdd   :  { %v2908_v1 = vpop.f32.mrb[1].mxu0  ;;  %v3012_v2 = vpop.f32.mrb[1].mxu1 }
  0xde   :  { %v3815_v5 = vpop.f32.mrb[2].mxu0  ;;  %v3817_v6 = vpop.f32.mrb[2].mxu1 }
  0xdf   :  { %v2909_v8 = vpop.f32.mrb[3].mxu0  ;;  %v3013_v9 = vpop.f32.mrb[3].mxu1 }
  0xe1   :  { %3123 = vmatmul.mubr.msk.bf16.gmra.mrb[108].mxu0 %vm214_vm3, %v3377_v3  ;;  %3227 = vmatmul.mubr.msk.bf16.gmra.mrb[108].mxu1 %vm214_vm3, %v3378_v4  ;;  %v3387_v3 = vld [vmem:[%s4783_s2 + $0x38] sm:$0xff]  }
  0xe2   :  { %3126 = vmatprep.mubr.msk.bf16.mxu0 %vm3425_vm2, %v4787_v0  ;;  %3230 = vmatprep.mubr.msk.bf16.mxu1 %vm3425_vm2, %v4787_v0  ;;  %v3388_v4 = vld [vmem:[%s4784_s3 + $0x38] sm:$0xff]  }
  0xe4   :  { %v3827_v10 = vpop.f32.mrb[4].mxu0  ;;  %v3829_v11 = vpop.f32.mrb[4].mxu1 }
  0xe5   :  { %v2912_v13 = vpop.f32.mrb[5].mxu0  ;;  %v3016_v14 = vpop.f32.mrb[5].mxu1 }
  0xe6   :  { %v3839_v17 = vpop.f32.mrb[6].mxu0  ;;  %v3841_v18 = vpop.f32.mrb[6].mxu1 }
  0xe7   :  { %v2913_v20 = vpop.f32.mrb[7].mxu0  ;;  %v3017_v21 = vpop.f32.mrb[7].mxu1 }
  0xe9   :  { %3127 = vmatmul.mubr.msk.bf16.gmra.mrb[112].mxu0 %vm214_vm3, %v3379_v15  ;;  %3231 = vmatmul.mubr.msk.bf16.gmra.mrb[112].mxu1 %vm214_vm3, %v3380_v16 }
  0xea   :  { %3130 = vmatprep.mubr.msk.bf16.mxu0 %vm3425_vm2, %v4787_v0  ;;  %3234 = vmatprep.mubr.msk.bf16.mxu1 %vm3425_vm2, %v4787_v0 }
  0xec   :  { %v3851_v22 = vpop.f32.mrb[8].mxu0  ;;  %v3853_v23 = vpop.f32.mrb[8].mxu1 }
  0xed   :  { %v2916_v25 = vpop.f32.mrb[9].mxu0  ;;  %v3020_v26 = vpop.f32.mrb[9].mxu1 }
  0xee   :  { %v3863_v29 = vpop.f32.mrb[10].mxu0  ;;  %v3865_v30 = vpop.f32.mrb[10].mxu1 }
  0xef   :  { %v2917_v32 = vpop.f32.mrb[11].mxu0  ;;  %v3021_v33 = vpop.f32.mrb[11].mxu1 }
  0xf1   :  { %3131 = vmatmul.mubr.msk.bf16.gmra.mrb[116].mxu0 %vm214_vm3, %v3381_v27  ;;  %3235 = vmatmul.mubr.msk.bf16.gmra.mrb[116].mxu1 %vm214_vm3, %v3382_v28  ;;  %v3389_v27 = vld [vmem:[%s4783_s2 + $0x40] sm:$0xff]  }
  0xf2   :  { %3134 = vmatprep.mubr.msk.bf16.mxu0 %vm3425_vm2, %v4787_v0  ;;  %3238 = vmatprep.mubr.msk.bf16.mxu1 %vm3425_vm2, %v4787_v0  ;;  %v3390_v28 = vld [vmem:[%s4784_s3 + $0x40] sm:$0xff]  }
  0xf4   :  { %v3875_v34 = vpop.f32.mrb[12].mxu0  ;;  %v3877_v35 = vpop.f32.mrb[12].mxu1 }
  0xf5   :  { %v2920_v37 = vpop.f32.mrb[13].mxu0  ;;  %v3024_v38 = vpop.f32.mrb[13].mxu1 }
  0xf6   :  { %v3887_v41 = vpop.f32.mrb[14].mxu0  ;;  %v3889_v42 = vpop.f32.mrb[14].mxu1 }
  0xf7   :  { %v2921_v44 = vpop.f32.mrb[15].mxu0  ;;  %v3025_v45 = vpop.f32.mrb[15].mxu1 }
  0xf9   :  { %3135 = vmatmul.mubr.msk.bf16.gmra.mrb[120].mxu0 %vm214_vm3, %v3383_v39  ;;  %3239 = vmatmul.mubr.msk.bf16.gmra.mrb[120].mxu1 %vm214_vm3, %v3384_v40 }
  0xfa   :  { %3138 = vmatprep.mubr.msk.bf16.mxu0 %vm3425_vm2, %v4787_v0  ;;  %3242 = vmatprep.mubr.msk.bf16.mxu1 %vm3425_vm2, %v4787_v0 }
  0xfc   :  { %v3899_v46 = vpop.f32.mrb[16].mxu0  ;;  %v3901_v47 = vpop.f32.mrb[16].mxu1 }
  0xfd   :  { %v2924_v49 = vpop.f32.mrb[17].mxu0  ;;  %v3028_v50 = vpop.f32.mrb[17].mxu1 }
  0xfe   :  { %v3911_v53 = vpop.f32.mrb[18].mxu0  ;;  %v3913_v54 = vpop.f32.mrb[18].mxu1 }
  0xff   :  { %v2925_v56 = vpop.f32.mrb[19].mxu0  ;;  %v3029_v57 = vpop.f32.mrb[19].mxu1 }
 0x101   :  { %3139 = vmatmul.mubr.msk.bf16.gmra.mrb[124].mxu0 %vm214_vm3, %v3385_v51  ;;  %3243 = vmatmul.mubr.msk.bf16.gmra.mrb[124].mxu1 %vm214_vm3, %v3386_v52  ;;  %v3391_v51 = vld [vmem:[%s4783_s2 + $0x48] sm:$0xff]  }
 0x102   :  { %3142 = vmatprep.mubr.msk.bf16.mxu0 %vm3425_vm2, %v4787_v0  ;;  %3246 = vmatprep.mubr.msk.bf16.mxu1 %vm3425_vm2, %v4787_v0  ;;  %v3392_v52 = vld [vmem:[%s4784_s3 + $0x48] sm:$0xff]  }
 0x104   :  { %v3923_v58 = vpop.f32.mrb[20].mxu0  ;;  %v3925_v59 = vpop.f32.mrb[20].mxu1 }
 0x105   :  { %v2928_v1 = vpop.f32.mrb[21].mxu0  ;;  %v3032_v2 = vpop.f32.mrb[21].mxu1 }
 0x106   :  { %v3935_v8 = vpop.f32.mrb[22].mxu0  ;;  %v3937_v9 = vpop.f32.mrb[22].mxu1 }
 0x107   :  { %v2929_v14 = vpop.f32.mrb[23].mxu0  ;;  %v3033_v15 = vpop.f32.mrb[23].mxu1 }
 0x109   :  { %3143 = vmatmul.mubr.msk.bf16.gmra.mrb[128].mxu0 %vm214_vm3, %v3387_v3  ;;  %3247 = vmatmul.mubr.msk.bf16.gmra.mrb[128].mxu1 %vm214_vm3, %v3388_v4 }
 0x10a   :  { %3146 = vmatprep.mubr.msk.bf16.mxu0 %vm3425_vm2, %v4787_v0  ;;  %3250 = vmatprep.mubr.msk.bf16.mxu1 %vm3425_vm2, %v4787_v0 }
 0x10c   :  { %v3947_v16 = vpop.f32.mrb[24].mxu0  ;;  %v3949_v20 = vpop.f32.mrb[24].mxu1 }
 0x10d   :  { %v2932_v25 = vpop.f32.mrb[25].mxu0  ;;  %v3036_v26 = vpop.f32.mrb[25].mxu1 }
 0x10e   :  { %v3959_v32 = vpop.f32.mrb[26].mxu0  ;;  %v3961_v33 = vpop.f32.mrb[26].mxu1 }
 0x10f   :  { %v2933_v38 = vpop.f32.mrb[27].mxu0  ;;  %v3037_v39 = vpop.f32.mrb[27].mxu1 }
 0x111   :  { %3147 = vmatmul.mubr.msk.bf16.gmra.mrb[132].mxu0 %vm214_vm3, %v3389_v27  ;;  %3251 = vmatmul.mubr.msk.bf16.gmra.mrb[132].mxu1 %vm214_vm3, %v3390_v28  ;;  %v3393_v27 = vld [vmem:[%s4783_s2 + $0x50] sm:$0xff]  }
 0x112   :  { %3150 = vmatprep.mubr.msk.bf16.mxu0 %vm3425_vm2, %v4787_v0  ;;  %3254 = vmatprep.mubr.msk.bf16.mxu1 %vm3425_vm2, %v4787_v0  ;;  %v3394_v28 = vld [vmem:[%s4784_s3 + $0x50] sm:$0xff]  }
 0x114   :  { %v3971_v40 = vpop.f32.mrb[28].mxu0  ;;  %v3973_v44 = vpop.f32.mrb[28].mxu1 }
 0x115   :  { %v2936_v49 = vpop.f32.mrb[29].mxu0  ;;  %v3040_v50 = vpop.f32.mrb[29].mxu1 }
 0x116   :  { %v3983_v56 = vpop.f32.mrb[30].mxu0  ;;  %v3985_v57 = vpop.f32.mrb[30].mxu1 }
 0x117   :  { %v2937_v2 = vpop.f32.mrb[31].mxu0  ;;  %v3041_v3 = vpop.f32.mrb[31].mxu1 }
 0x119   :  { %3151 = vmatmul.mubr.msk.bf16.gmra.mrb[136].mxu0 %vm214_vm3, %v3391_v51  ;;  %3255 = vmatmul.mubr.msk.bf16.gmra.mrb[136].mxu1 %vm214_vm3, %v3392_v52 }
 0x11a   :  { %3154 = vmatprep.mubr.msk.bf16.mxu0 %vm3425_vm2, %v4787_v0  ;;  %3258 = vmatprep.mubr.msk.bf16.mxu1 %vm3425_vm2, %v4787_v0 }
 0x11c   :  { %v3995_v4 = vpop.f32.mrb[32].mxu0  ;;  %v3997_v14 = vpop.f32.mrb[32].mxu1 }
 0x11d   :  { %v2940_v25 = vpop.f32.mrb[33].mxu0  ;;  %v3044_v26 = vpop.f32.mrb[33].mxu1 }
 0x11e   :  { %v4007_v38 = vpop.f32.mrb[34].mxu0  ;;  %v4009_v39 = vpop.f32.mrb[34].mxu1 }
 0x11f   :  { %v2941_v50 = vpop.f32.mrb[35].mxu0  ;;  %v3045_v51 = vpop.f32.mrb[35].mxu1 }
 0x121   :  { %3155 = vmatmul.mubr.msk.bf16.gmra.mrb[140].mxu0 %vm214_vm3, %v3393_v27  ;;  %3259 = vmatmul.mubr.msk.bf16.gmra.mrb[140].mxu1 %vm214_vm3, %v3394_v28  ;;  %v3395_v27 = vld [vmem:[%s4783_s2 + $0x58] sm:$0xff]  }
 0x122   :  { %3158 = vmatprep.mubr.msk.bf16.mxu0 %vm3425_vm2, %v4787_v0  ;;  %3262 = vmatprep.mubr.msk.bf16.mxu1 %vm3425_vm2, %v4787_v0  ;;  %v3396_v28 = vld [vmem:[%s4784_s3 + $0x58] sm:$0xff]  }
 0x124   :  { %v4019_v52 = vpop.f32.mrb[36].mxu0  ;;  %v4021_v2 = vpop.f32.mrb[36].mxu1 }
 0x125   :  { %v2944_v25 = vpop.f32.mrb[37].mxu0  ;;  %v3048_v26 = vpop.f32.mrb[37].mxu1 }
 0x126   :  { %v4031_v50 = vpop.f32.mrb[38].mxu0  ;;  %v4033_v51 = vpop.f32.mrb[38].mxu1 }
 0x127   :  { %v2945_v15 = vpop.f32.mrb[39].mxu0  ;;  %v3049_v1 = vpop.f32.mrb[39].mxu1 }
 0x128   :  { %v3397_v1 = vld [vmem:[%s4783_s2 + $0x60] sm:$0xff]  }
 0x129   :  { %3159 = vmatmul.mubr.msk.bf16.gmra.mrb[144].mxu0 %vm214_vm3, %v3395_v27  ;;  %3263 = vmatmul.mubr.msk.bf16.gmra.mrb[144].mxu1 %vm214_vm3, %v3396_v28  ;;  %v3398_v27 = vld [vmem:[%s4784_s3 + $0x60] sm:$0xff]  }
 0x12a   :  { %3162 = vmatprep.mubr.msk.bf16.mxu0 %vm3425_vm2, %v4787_v0  ;;  %3266 = vmatprep.mubr.msk.bf16.mxu1 %vm3425_vm2, %v4787_v0 }
 0x12c   :  { %v4043_v25 = vpop.f32.mrb[40].mxu0  ;;  %v4045_v26 = vpop.f32.mrb[40].mxu1 }
 0x12d   :  { %v2948_v49 = vpop.f32.mrb[41].mxu0  ;;  %v3052_v15 = vpop.f32.mrb[41].mxu1 }
 0x12e   :  { %v4055_v28 = vpop.f32.mrb[42].mxu0  ;;  %v4057_v45 = vpop.f32.mrb[42].mxu1 }
 0x12f   :  { %v2949_v21 = vpop.f32.mrb[43].mxu0  ;;  %v3053_v13 = vpop.f32.mrb[43].mxu1 }
 0x130   :  { %v3399_v13 = vld [vmem:[%s4783_s2 + $0x68] sm:$0xff]  }
 0x131   :  { %3163 = vmatmul.mubr.msk.bf16.gmra.mrb[148].mxu0 %vm214_vm3, %v3397_v1  ;;  %3267 = vmatmul.mubr.msk.bf16.gmra.mrb[148].mxu1 %vm214_vm3, %v3398_v27  ;;  %v3400_v1 = vld [vmem:[%s4784_s3 + $0x68] sm:$0xff]  }
 0x132   :  { %3166 = vmatprep.mubr.msk.bf16.mxu0 %vm3425_vm2, %v4787_v0  ;;  %3270 = vmatprep.mubr.msk.bf16.mxu1 %vm3425_vm2, %v4787_v0 }
 0x134   :  { %v4067_v49 = vpop.f32.mrb[44].mxu0  ;;  %v4069_v15 = vpop.f32.mrb[44].mxu1 }
 0x135   :  { %4844 = vst [vmem:[#allocation2_spill] sm:$0xff] %v4069_v15  ;;  %v2952_v37 = vpop.f32.mrb[45].mxu0  ;;  %v3056_v21 = vpop.f32.mrb[45].mxu1 }
 0x136   :  { %v4079_v27 = vpop.f32.mrb[46].mxu0  ;;  %v4081_v60 = vpop.f32.mrb[46].mxu1 }
 0x137   :  { %4845 = vst [vmem:[#allocation3_spill] sm:$0xff] %v4079_v27  ;;  %4846 = vst [vmem:[#allocation4_spill] sm:$0xff] %v4081_v60  ;;  %v2953_v48 = vpop.f32.mrb[47].mxu0  ;;  %v3057_v43 = vpop.f32.mrb[47].mxu1 }
 0x138   :  { %v3401_v43 = vld [vmem:[%s4783_s2 + $0x70] sm:$0xff]  }
 0x139   :  { %3167 = vmatmul.mubr.msk.bf16.gmra.mrb[152].mxu0 %vm214_vm3, %v3399_v13  ;;  %3271 = vmatmul.mubr.msk.bf16.gmra.mrb[152].mxu1 %vm214_vm3, %v3400_v1  ;;  %v3402_v13 = vld [vmem:[%s4784_s3 + $0x70] sm:$0xff]  }
 0x13a   :  { %3170 = vmatprep.mubr.msk.bf16.mxu0 %vm3425_vm2, %v4787_v0  ;;  %3274 = vmatprep.mubr.msk.bf16.mxu1 %vm3425_vm2, %v4787_v0 }
 0x13c   :  { %v4091_v37 = vpop.f32.mrb[48].mxu0  ;;  %v4093_v21 = vpop.f32.mrb[48].mxu1 }
 0x13d   :  { %4847 = vst [vmem:[#allocation5_spill] sm:$0xff] %v4091_v37  ;;  %4848 = vst [vmem:[#allocation6_spill] sm:$0xff] %v4093_v21  ;;  %v2956_v55 = vpop.f32.mrb[49].mxu0  ;;  %v3060_v48 = vpop.f32.mrb[49].mxu1 }
 0x13e   :  { %v4103_v1 = vpop.f32.mrb[50].mxu0  ;;  %v4105_v36 = vpop.f32.mrb[50].mxu1 }
 0x13f   :  { %4849 = vst [vmem:[#allocation7_spill] sm:$0xff] %v4103_v1  ;;  %4850 = vst [vmem:[#allocation8_spill] sm:$0xff] %v4105_v36  ;;  %v2957_v24 = vpop.f32.mrb[51].mxu0  ;;  %v3061_v19 = vpop.f32.mrb[51].mxu1 }
 0x140   :  { %v3403_v19 = vld [vmem:[%s4783_s2 + $0x78] sm:$0xff]  }
 0x141   :  { %3171 = vmatmul.mubr.msk.bf16.gmra.mrb[156].mxu0 %vm214_vm3, %v3401_v43  ;;  %3275 = vmatmul.mubr.msk.bf16.gmra.mrb[156].mxu1 %vm214_vm3, %v3402_v13  ;;  %v3404_v43 = vld [vmem:[%s4784_s3 + $0x78] sm:$0xff]  }
 0x142   :  { %3174 = vmatprep.mubr.msk.bf16.mxu0 %vm3425_vm2, %v4787_v0  ;;  %3278 = vmatprep.mubr.msk.bf16.mxu1 %vm3425_vm2, %v4787_v0 }
 0x144   :  { %v4115_v55 = vpop.f32.mrb[52].mxu0  ;;  %v4117_v48 = vpop.f32.mrb[52].mxu1 }
 0x145   :  { %4851 = vst [vmem:[#allocation9_spill] sm:$0xff] %v4115_v55  ;;  %4852 = vst [vmem:[#allocation10_spill] sm:$0xff] %v4117_v48  ;;  %v2960_v31 = vpop.f32.mrb[53].mxu0  ;;  %v3064_v24 = vpop.f32.mrb[53].mxu1 }
 0x146   :  { %v4127_v13 = vpop.f32.mrb[54].mxu0  ;;  %v4129_v12 = vpop.f32.mrb[54].mxu1  ;;  %v4855_v31 = vmov 0.0  }
 0x147   :  { %4853 = vst [vmem:[#allocation11_spill] sm:$0xff] %v4127_v13  ;;  %4854 = vst [vmem:[#allocation12_spill] sm:$0xff] %v4129_v12  ;;  %v2961_v63 = vpop.f32.mrb[55].mxu0  ;;  %v3065_v0 = vpop.f32.mrb[55].mxu1 }
 0x148   :  { %v3405_v0 = vld [vmem:[%s4783_s2 + $0x80] sm:$0xff]  }
 0x149   :  { %3175 = vmatmul.mubr.msk.bf16.gmra.mrb[160].mxu0 %vm214_vm3, %v3403_v19  ;;  %3279 = vmatmul.mubr.msk.bf16.gmra.mrb[160].mxu1 %vm214_vm3, %v3404_v43  ;;  %v3406_v19 = vld [vmem:[%s4784_s3 + $0x80] sm:$0xff]  }
 0x14a   :  { %3178 = vmatprep.mubr.msk.bf16.mxu0 %vm3425_vm2, %v4855_v31  ;;  %3282 = vmatprep.mubr.msk.bf16.mxu1 %vm3425_vm2, %v4855_v31 }
 0x14c   :  { %v4139_v24 = vpop.f32.mrb[56].mxu0  ;;  %v4141_v3 = vpop.f32.mrb[56].mxu1 }
 0x14d   :  { %4856 = vst [vmem:[#allocation13_spill] sm:$0xff] %v4139_v24  ;;  %4857 = vst [vmem:[#allocation14_spill] sm:$0xff] %v4141_v3  ;;  %v2964_v7 = vpop.f32.mrb[57].mxu0  ;;  %v3068_v63 = vpop.f32.mrb[57].mxu1 }
 0x14e   :  { %v4151_v43 = vpop.f32.mrb[58].mxu0  ;;  %v4153_v12 = vpop.f32.mrb[58].mxu1 }
 0x14f   :  { %4858 = vst [vmem:[#allocation15_spill] sm:$0xff] %v4151_v43  ;;  %4859 = vst [vmem:[#allocation16_spill] sm:$0xff] %v4153_v12  ;;  %v2965_v55 = vpop.f32.mrb[59].mxu0  ;;  %v3069_v36 = vpop.f32.mrb[59].mxu1 }
 0x150   :  { %v3407_v36 = vld [vmem:[%s4783_s2 + $0x88] sm:$0xff]  }
 0x151   :  { %3179 = vmatmul.mubr.msk.bf16.gmra.mrb[164].mxu0 %vm214_vm3, %v3405_v0  ;;  %3283 = vmatmul.mubr.msk.bf16.gmra.mrb[164].mxu1 %vm214_vm3, %v3406_v19  ;;  %v3408_v0 = vld [vmem:[%s4784_s3 + $0x88] sm:$0xff]  }
 0x152   :  { %3182 = vmatprep.mubr.msk.bf16.mxu0 %vm3425_vm2, %v4855_v31  ;;  %3286 = vmatprep.mubr.msk.bf16.mxu1 %vm3425_vm2, %v4855_v31 }
 0x154   :  { %v4163_v7 = vpop.f32.mrb[60].mxu0  ;;  %v4165_v63 = vpop.f32.mrb[60].mxu1 }
 0x155   :  { %4860 = vst [vmem:[#allocation17_spill] sm:$0xff] %v4163_v7  ;;  %4861 = vst [vmem:[#allocation18_spill] sm:$0xff] %v4165_v63  ;;  %v2968_v13 = vpop.f32.mrb[61].mxu0  ;;  %v3072_v55 = vpop.f32.mrb[61].mxu1 }
 0x156   :  { %v4175_v19 = vpop.f32.mrb[62].mxu0  ;;  %v4177_v12 = vpop.f32.mrb[62].mxu1 }
 0x157   :  { %4862 = vst [vmem:[#allocation19_spill] sm:$0xff] %v4175_v19  ;;  %4863 = vst [vmem:[#allocation20_spill] sm:$0xff] %v4177_v12  ;;  %v2969_v3 = vpop.f32.mrb[63].mxu0  ;;  %v3073_v24 = vpop.f32.mrb[63].mxu1 }
 0x158   :  { %v3409_v24 = vld [vmem:[%s4783_s2 + $0x90] sm:$0xff]  }
 0x159   :  { %3183 = vmatmul.mubr.msk.bf16.gmra.mrb[168].mxu0 %vm214_vm3, %v3407_v36  ;;  %3287 = vmatmul.mubr.msk.bf16.gmra.mrb[168].mxu1 %vm214_vm3, %v3408_v0  ;;  %v3410_v36 = vld [vmem:[%s4784_s3 + $0x90] sm:$0xff]  }
 0x15a   :  { %3186 = vmatprep.mubr.msk.bf16.mxu0 %vm3425_vm2, %v4855_v31  ;;  %3290 = vmatprep.mubr.msk.bf16.mxu1 %vm3425_vm2, %v4855_v31 }
 0x15c   :  { %v4187_v13 = vpop.f32.mrb[64].mxu0  ;;  %v4189_v55 = vpop.f32.mrb[64].mxu1 }
 0x15d   :  { %4864 = vst [vmem:[#allocation21_spill] sm:$0xff] %v4187_v13  ;;  %4865 = vst [vmem:[#allocation22_spill] sm:$0xff] %v4189_v55  ;;  %v2972_v43 = vpop.f32.mrb[65].mxu0  ;;  %v3076_v3 = vpop.f32.mrb[65].mxu1 }
 0x15e   :  { %v4199_v0 = vpop.f32.mrb[66].mxu0  ;;  %v4201_v12 = vpop.f32.mrb[66].mxu1 }
 0x15f   :  { %4866 = vst [vmem:[#allocation23_spill] sm:$0xff] %v4199_v0  ;;  %4867 = vst [vmem:[#allocation24_spill] sm:$0xff] %v4201_v12  ;;  %v2973_v63 = vpop.f32.mrb[67].mxu0  ;;  %v3077_v7 = vpop.f32.mrb[67].mxu1 }
 0x160   :  { %v3411_v7 = vld [vmem:[%s4783_s2 + $0x98] sm:$0xff]  }
 0x161   :  { %3187 = vmatmul.mubr.msk.bf16.gmra.mrb[172].mxu0 %vm214_vm3, %v3409_v24  ;;  %3291 = vmatmul.mubr.msk.bf16.gmra.mrb[172].mxu1 %vm214_vm3, %v3410_v36  ;;  %v3412_v24 = vld [vmem:[%s4784_s3 + $0x98] sm:$0xff]  }
 0x162   :  { %3190 = vmatprep.mubr.msk.bf16.mxu0 %vm3425_vm2, %v4855_v31  ;;  %3294 = vmatprep.mubr.msk.bf16.mxu1 %vm3425_vm2, %v4855_v31 }
 0x164   :  { %v4211_v43 = vpop.f32.mrb[68].mxu0  ;;  %v4213_v3 = vpop.f32.mrb[68].mxu1 }
 0x165   :  { %4868 = vst [vmem:[#allocation25_spill] sm:$0xff] %v4211_v43  ;;  %4869 = vst [vmem:[#allocation26_spill] sm:$0xff] %v4213_v3  ;;  %v2976_v19 = vpop.f32.mrb[69].mxu0  ;;  %v3080_v63 = vpop.f32.mrb[69].mxu1 }
 0x166   :  { %v4223_v36 = vpop.f32.mrb[70].mxu0  ;;  %v4225_v12 = vpop.f32.mrb[70].mxu1 }
 0x167   :  { %4870 = vst [vmem:[#allocation27_spill] sm:$0xff] %v4223_v36  ;;  %4871 = vst [vmem:[#allocation28_spill] sm:$0xff] %v4225_v12  ;;  %v2977_v55 = vpop.f32.mrb[71].mxu0  ;;  %v3081_v13 = vpop.f32.mrb[71].mxu1 }
 0x168   :  { %v3413_v13 = vld [vmem:[%s4783_s2 + $0xa0] sm:$0xff]  }
 0x169   :  { %3191 = vmatmul.mubr.msk.bf16.gmra.mrb[176].mxu0 %vm214_vm3, %v3411_v7  ;;  %3295 = vmatmul.mubr.msk.bf16.gmra.mrb[176].mxu1 %vm214_vm3, %v3412_v24  ;;  %v3414_v7 = vld [vmem:[%s4784_s3 + $0xa0] sm:$0xff]  }
 0x16a   :  { %3194 = vmatprep.mubr.msk.bf16.mxu0 %vm3425_vm2, %v4855_v31  ;;  %3298 = vmatprep.mubr.msk.bf16.mxu1 %vm3425_vm2, %v4855_v31 }
 0x16c   :  { %v4235_v19 = vpop.f32.mrb[72].mxu0  ;;  %v4237_v63 = vpop.f32.mrb[72].mxu1 }
 0x16d   :  { %4872 = vst [vmem:[#allocation29_spill] sm:$0xff] %v4235_v19  ;;  %4873 = vst [vmem:[#allocation30_spill] sm:$0xff] %v4237_v63  ;;  %v2980_v0 = vpop.f32.mrb[73].mxu0  ;;  %v3084_v55 = vpop.f32.mrb[73].mxu1 }
 0x16e   :  { %v4247_v24 = vpop.f32.mrb[74].mxu0  ;;  %v4249_v12 = vpop.f32.mrb[74].mxu1 }
 0x16f   :  { %4874 = vst [vmem:[#allocation31_spill] sm:$0xff] %v4247_v24  ;;  %4875 = vst [vmem:[#allocation32_spill] sm:$0xff] %v4249_v12  ;;  %v2981_v3 = vpop.f32.mrb[75].mxu0  ;;  %v3085_v43 = vpop.f32.mrb[75].mxu1 }
 0x170   :  { %v3415_v43 = vld [vmem:[%s4783_s2 + $0xa8] sm:$0xff]  }
 0x171   :  { %3195 = vmatmul.mubr.msk.bf16.gmra.mrb[180].mxu0 %vm214_vm3, %v3413_v13  ;;  %3299 = vmatmul.mubr.msk.bf16.gmra.mrb[180].mxu1 %vm214_vm3, %v3414_v7  ;;  %v3416_v13 = vld [vmem:[%s4784_s3 + $0xa8] sm:$0xff]  }
 0x172   :  { %3198 = vmatprep.mubr.msk.bf16.mxu0 %vm3425_vm2, %v4855_v31  ;;  %3302 = vmatprep.mubr.msk.bf16.mxu1 %vm3425_vm2, %v4855_v31 }
 0x174   :  { %v4259_v0 = vpop.f32.mrb[76].mxu0  ;;  %v4261_v55 = vpop.f32.mrb[76].mxu1 }
 0x175   :  { %4876 = vst [vmem:[#allocation33_spill] sm:$0xff] %v4259_v0  ;;  %4877 = vst [vmem:[#allocation34_spill] sm:$0xff] %v4261_v55  ;;  %v2984_v36 = vpop.f32.mrb[77].mxu0  ;;  %v3088_v3 = vpop.f32.mrb[77].mxu1 }
 0x176   :  { %v4271_v7 = vpop.f32.mrb[78].mxu0  ;;  %v4273_v12 = vpop.f32.mrb[78].mxu1 }
 0x177   :  { %4878 = vst [vmem:[#allocation35_spill] sm:$0xff] %v4271_v7  ;;  %4879 = vst [vmem:[#allocation36_spill] sm:$0xff] %v4273_v12  ;;  %v2985_v63 = vpop.f32.mrb[79].mxu0  ;;  %v3089_v19 = vpop.f32.mrb[79].mxu1 }
 0x178   :  { %v3417_v19 = vld [vmem:[%s4783_s2 + $0xb0] sm:$0xff]  }
 0x179   :  { %3199 = vmatmul.mubr.msk.bf16.gmra.mrb[184].mxu0 %vm214_vm3, %v3415_v43  ;;  %3303 = vmatmul.mubr.msk.bf16.gmra.mrb[184].mxu1 %vm214_vm3, %v3416_v13  ;;  %v3418_v43 = vld [vmem:[%s4784_s3 + $0xb0] sm:$0xff]  }
 0x17a   :  { %3202 = vmatprep.mubr.msk.bf16.mxu0 %vm3425_vm2, %v4855_v31  ;;  %3306 = vmatprep.mubr.msk.bf16.mxu1 %vm3425_vm2, %v4855_v31 }
 0x17c   :  { %v4283_v36 = vpop.f32.mrb[80].mxu0  ;;  %v4285_v3 = vpop.f32.mrb[80].mxu1 }
 0x17d   :  { %4880 = vst [vmem:[#allocation37_spill] sm:$0xff] %v4283_v36  ;;  %4881 = vst [vmem:[#allocation38_spill] sm:$0xff] %v4285_v3  ;;  %v2988_v24 = vpop.f32.mrb[81].mxu0  ;;  %v3092_v63 = vpop.f32.mrb[81].mxu1 }
 0x17e   :  { %v4295_v13 = vpop.f32.mrb[82].mxu0  ;;  %v4297_v12 = vpop.f32.mrb[82].mxu1 }
 0x17f   :  { %4882 = vst [vmem:[#allocation39_spill] sm:$0xff] %v4295_v13  ;;  %4883 = vst [vmem:[#allocation40_spill] sm:$0xff] %v4297_v12  ;;  %v2989_v55 = vpop.f32.mrb[83].mxu0  ;;  %v3093_v0 = vpop.f32.mrb[83].mxu1 }
 0x180   :  { %v3419_v0 = vld [vmem:[%s4783_s2 + $0xb8] sm:$0xff]  }
 0x181   :  { %3203 = vmatmul.mubr.msk.bf16.gmra.mrb[188].mxu0 %vm214_vm3, %v3417_v19  ;;  %3307 = vmatmul.mubr.msk.bf16.gmra.mrb[188].mxu1 %vm214_vm3, %v3418_v43  ;;  %v3420_v19 = vld [vmem:[%s4784_s3 + $0xb8] sm:$0xff]  }
 0x182   :  { %3206 = vmatprep.mubr.msk.bf16.mxu0 %vm3425_vm2, %v4855_v31  ;;  %3310 = vmatprep.mubr.msk.bf16.mxu1 %vm3425_vm2, %v4855_v31 }
 0x184   :  { %v4307_v24 = vpop.f32.mrb[84].mxu0  ;;  %v4309_v63 = vpop.f32.mrb[84].mxu1 }
 0x185   :  { %4884 = vst [vmem:[#allocation41_spill] sm:$0xff] %v4307_v24  ;;  %4885 = vst [vmem:[#allocation42_spill] sm:$0xff] %v4309_v63  ;;  %v2992_v7 = vpop.f32.mrb[85].mxu0  ;;  %v3096_v55 = vpop.f32.mrb[85].mxu1 }
 0x186   :  { %v4319_v43 = vpop.f32.mrb[86].mxu0  ;;  %v4321_v12 = vpop.f32.mrb[86].mxu1 }
 0x187   :  { %4886 = vst [vmem:[#allocation43_spill] sm:$0xff] %v4319_v43  ;;  %4887 = vst [vmem:[#allocation44_spill] sm:$0xff] %v4321_v12  ;;  %v2993_v3 = vpop.f32.mrb[87].mxu0  ;;  %v3097_v36 = vpop.f32.mrb[87].mxu1 }
 0x188   :  { %v3421_v36 = vld [vmem:[%s4783_s2 + $0xc0] sm:$0xff]  }
 0x189   :  { %3207 = vmatmul.mubr.msk.bf16.gmra.mrb[192].mxu0 %vm214_vm3, %v3419_v0  ;;  %3311 = vmatmul.mubr.msk.bf16.gmra.mrb[192].mxu1 %vm214_vm3, %v3420_v19  ;;  %v3422_v0 = vld [vmem:[%s4784_s3 + $0xc0] sm:$0xff]  }
 0x18a   :  { %3210 = vmatprep.mubr.msk.bf16.mxu0 %vm3425_vm2, %v4855_v31  ;;  %3314 = vmatprep.mubr.msk.bf16.mxu1 %vm3425_vm2, %v4855_v31 }
 0x18c   :  { %v4331_v7 = vpop.f32.mrb[88].mxu0  ;;  %v4333_v55 = vpop.f32.mrb[88].mxu1 }
 0x18d   :  { %4888 = vst [vmem:[#allocation45_spill] sm:$0xff] %v4331_v7  ;;  %4889 = vst [vmem:[#allocation46_spill] sm:$0xff] %v4333_v55  ;;  %v2996_v13 = vpop.f32.mrb[89].mxu0  ;;  %v3100_v3 = vpop.f32.mrb[89].mxu1 }
 0x18e   :  { %v4343_v19 = vpop.f32.mrb[90].mxu0  ;;  %v4345_v31 = vpop.f32.mrb[90].mxu1 }
 0x18f   :  { %4890 = vst [vmem:[#allocation47_spill] sm:$0xff] %v4343_v19  ;;  %4891 = vst [vmem:[#allocation48_spill] sm:$0xff] %v4345_v31  ;;  %v2997_v43 = vpop.f32.mrb[91].mxu0  ;;  %v3101_v63 = vpop.f32.mrb[91].mxu1  ;;  %v4378_v31 = vld [vmem:[%s4785_s5] ss:$0 sm:$0xff] }
 0x191   :  { %3211 = vmatmul.mubr.msk.bf16.gmra.mrb[196].mxu0 %vm214_vm3, %v3421_v36  ;;  %3315 = vmatmul.mubr.msk.bf16.gmra.mrb[196].mxu1 %vm214_vm3, %v3422_v0 }
 0x194   :  { %v4351_v13 = vpop.f32.mrb[92].mxu0  ;;  %v4353_v3 = vpop.f32.mrb[92].mxu1 }
 0x195   :  { %4892 = vst [vmem:[#allocation49_spill] sm:$0xff] %v4351_v13  ;;  %4893 = vst [vmem:[#allocation50_spill] sm:$0xff] %v4353_v3  ;;  %v3000_v55 = vpop.f32.mrb[93].mxu0  ;;  %v3104_v7 = vpop.f32.mrb[93].mxu1 }
 0x196   :  { %v4357_v24 = vpop.f32.mrb[94].mxu0  ;;  %v4359_v1 = vpop.f32.mrb[94].mxu1 }
 0x197   :  { %4894 = vst [vmem:[#allocation51_spill] sm:$0xff] %v4357_v24  ;;  %4895 = vst [vmem:[#allocation52_spill] sm:$0xff] %v4359_v1  ;;  %v3001_v43 = vpop.f32.mrb[95].mxu0  ;;  %v3105_v36 = vpop.f32.mrb[95].mxu1 }
 0x19c   :  { %v4363_v12 = vpop.f32.mrb[96].mxu0  ;;  %v4365_v0 = vpop.f32.mrb[96].mxu1 }
 0x19d   :  { %4896 = vst [vmem:[#allocation53_spill] sm:$0xff] %v4363_v12  ;;  %4897 = vst [vmem:[#allocation54_spill] sm:$0xff] %v4365_v0  ;;  %v3004_v19 = vpop.f32.mrb[97].mxu0  ;;  %v3108_v48 = vpop.f32.mrb[97].mxu1  ;;  %v4900_v0 = vmax.f32 %v3803_v61, %v3805_v62 }
 0x19e   :  { %v4369_v55 = vpop.f32.mrb[98].mxu0  ;;  %v4371_v7 = vpop.f32.mrb[98].mxu1 }
 0x19f   :  { %4898 = vst [vmem:[#allocation55_spill] sm:$0xff] %v4369_v55  ;;  %4899 = vst [vmem:[#allocation56_spill] sm:$0xff] %v4371_v7  ;;  %v3005_v13 = vpop.f32.mrb[99].mxu0  ;;  %v3109_v63 = vpop.f32.mrb[99].mxu1 }
 0x1a4   :  { %v1347_v43 = vpop.f32.mrb[100].mxu0  ;;  %v1830_v36 = vpop.f32.mrb[100].mxu1 }
 0x1a5   :  { %v2029_v1 = vmax.f32 %v1347_v43, %v1830_v36  ;;  %v3116_v24 = vpop.f32.mrb[101].mxu0  ;;  %v3220_v21 = vpop.f32.mrb[101].mxu1 }
 0x1a6   :  { %v1350_v48 = vpop.f32.mrb[102].mxu0  ;;  %v1833_v19 = vpop.f32.mrb[102].mxu1  ;;  %v4901_v24 = vmax.f32 %v3815_v5, %v3817_v6  ;;  %v4902_v6 = vmax.f32 %v3827_v10, %v3829_v11 }
 0x1a7   :  { %v2079_v12 = vmax.f32 %v4900_v0, %v2029_v1  ;;  %v2030_v37 = vmax.f32 %v1350_v48, %v1833_v19  ;;  %v3117_v3 = vpop.f32.mrb[103].mxu0  ;;  %v3221_v13 = vpop.f32.mrb[103].mxu1 }
 0x1a9   :  { %v2136_v63 = vadd.f32 %v4378_v31, %v2079_v12  ;;  %v2080_v21 = vmax.f32 %v4901_v24, %v2030_v37 }
 0x1ab   :  { %v2186_v43 = vmax.f32 %v2136_v63, 0.0  ;;  %v2137_v36 = vadd.f32 %v4378_v31, %v2080_v21 }
 0x1ac   :  { %v1355_v7 = vpop.f32.mrb[104].mxu0  ;;  %v1838_v55 = vpop.f32.mrb[104].mxu1 }
 0x1ad   :  { %v2744_v60 = vpack.c.bf16 %v2186_v43, %v2186_v43  ;;  %v2187_v27 = vmax.f32 %v2137_v36, 0.0  ;;  %v2031_v15 = vmax.f32 %v1355_v7, %v1838_v55  ;;  %v3120_v61 = vpop.f32.mrb[105].mxu0  ;;  %v3224_v62 = vpop.f32.mrb[105].mxu1  ;;  %v4903_v7 = vmax.f32 %v3839_v17, %v3841_v18 }
 0x1ae   :  { %v1358_v1 = vpop.f32.mrb[106].mxu0  ;;  %v1841_v3 = vpop.f32.mrb[106].mxu1  ;;  %v4904_v17 = vmax.f32 %v3851_v22, %v3853_v23 }
 0x1af   :  { %2437 = vst.msk [vmem:[%s4786_s6] sm:$0xf] %vm2436_vm4, %v2744_v60  ;;  %v2745_v5 = vpack.c.bf16 %v2187_v27, %v2187_v27  ;;  %v2081_v12 = vmax.f32 %v4902_v6, %v2031_v15  ;;  %v2032_v37 = vmax.f32 %v1358_v1, %v1841_v3  ;;  %v3121_v0 = vpop.f32.mrb[107].mxu0  ;;  %v3225_v48 = vpop.f32.mrb[107].mxu1  ;;  %v4905_v6 = vmax.f32 %v3863_v29, %v3865_v30 }
 0x1b0   :  { %v4906_v29 = vmax.f32 %v3875_v34, %v3877_v35 }
 0x1b1   :  { %2438 = vst.msk [vmem:[%s4786_s6 + $0x4] sm:$0xf] %vm2436_vm4, %v2745_v5  ;;  %v2138_v55 = vadd.f32 %v4378_v31, %v2081_v12  ;;  %v2082_v19 = vmax.f32 %v4903_v7, %v2032_v37 }
 0x1b3   :  { %v2188_v60 = vmax.f32 %v2138_v55, 0.0  ;;  %v2139_v27 = vadd.f32 %v4378_v31, %v2082_v19 }
 0x1b4   :  { %v1363_v13 = vpop.f32.mrb[108].mxu0  ;;  %v1846_v10 = vpop.f32.mrb[108].mxu1 }
 0x1b5   :  { %v2746_v11 = vpack.c.bf16 %v2188_v60, %v2188_v60  ;;  %v2189_v15 = vmax.f32 %v2139_v27, 0.0  ;;  %v2033_v63 = vmax.f32 %v1363_v13, %v1846_v10  ;;  %v3124_v24 = vpop.f32.mrb[109].mxu0  ;;  %v3228_v21 = vpop.f32.mrb[109].mxu1 }
 0x1b6   :  { %v1366_v43 = vpop.f32.mrb[110].mxu0  ;;  %v1849_v36 = vpop.f32.mrb[110].mxu1  ;;  %v4907_v21 = vmax.f32 %v3887_v41, %v3889_v42  ;;  %v4908_v41 = vmax.f32 %v3899_v46, %v3901_v47 }
 0x1b7   :  { %2439 = vst.msk [vmem:[%s4786_s6 + $0x8] sm:$0xf] %vm2436_vm4, %v2746_v11  ;;  %v2747_v61 = vpack.c.bf16 %v2189_v15, %v2189_v15  ;;  %v2083_v18 = vmax.f32 %v4904_v17, %v2033_v63  ;;  %v2034_v62 = vmax.f32 %v1366_v43, %v1849_v36  ;;  %v3125_v1 = vpop.f32.mrb[111].mxu0  ;;  %v3229_v3 = vpop.f32.mrb[111].mxu1 }
 0x1b9   :  { %2440 = vst.msk [vmem:[%s4786_s6 + $0xc] sm:$0xf] %vm2436_vm4, %v2747_v61  ;;  %v2140_v5 = vadd.f32 %v4378_v31, %v2083_v18  ;;  %v2084_v12 = vmax.f32 %v4905_v6, %v2034_v62 }
 0x1bb   :  { %v2190_v37 = vmax.f32 %v2140_v5, 0.0  ;;  %v2141_v0 = vadd.f32 %v4378_v31, %v2084_v12 }
 0x1bc   :  { %v1371_v48 = vpop.f32.mrb[112].mxu0  ;;  %v1854_v22 = vpop.f32.mrb[112].mxu1 }
 0x1bd   :  { %v2748_v23 = vpack.c.bf16 %v2190_v37, %v2190_v37  ;;  %v2191_v55 = vmax.f32 %v2141_v0, 0.0  ;;  %v2035_v7 = vmax.f32 %v1371_v48, %v1854_v22  ;;  %v3128_v19 = vpop.f32.mrb[113].mxu0  ;;  %v3232_v60 = vpop.f32.mrb[113].mxu1 }
 0x1be   :  { %v1374_v27 = vpop.f32.mrb[114].mxu0  ;;  %v1857_v13 = vpop.f32.mrb[114].mxu1 }
 0x1bf   :  { %2441 = vst.msk [vmem:[%s4786_s6 + $0x10] sm:$0xf] %vm2436_vm4, %v2748_v23  ;;  %v2749_v10 = vpack.c.bf16 %v2191_v55, %v2191_v55  ;;  %v2085_v30 = vmax.f32 %v4906_v29, %v2035_v7  ;;  %v2036_v11 = vmax.f32 %v1374_v27, %v1857_v13  ;;  %v3129_v15 = vpop.f32.mrb[115].mxu0  ;;  %v3233_v63 = vpop.f32.mrb[115].mxu1  ;;  %v4909_v23 = vmax.f32 %v3911_v53, %v3913_v54 }
 0x1c0   :  { %v4910_v53 = vmax.f32 %v3923_v58, %v3925_v59 }
 0x1c1   :  { %2442 = vst.msk [vmem:[%s4786_s6 + $0x14] sm:$0xf] %vm2436_vm4, %v2749_v10  ;;  %v2142_v24 = vadd.f32 %v4378_v31, %v2085_v30  ;;  %v2086_v43 = vmax.f32 %v4907_v21, %v2036_v11 }
 0x1c3   :  { %v2192_v36 = vmax.f32 %v2142_v24, 0.0  ;;  %v2143_v61 = vadd.f32 %v4378_v31, %v2086_v43 }
 0x1c4   :  { %v1379_v17 = vpop.f32.mrb[116].mxu0  ;;  %v1862_v34 = vpop.f32.mrb[116].mxu1 }
 0x1c5   :  { %v2750_v35 = vpack.c.bf16 %v2192_v36, %v2192_v36  ;;  %v2193_v18 = vmax.f32 %v2143_v61, 0.0  ;;  %v2037_v62 = vmax.f32 %v1379_v17, %v1862_v34  ;;  %v3132_v1 = vpop.f32.mrb[117].mxu0  ;;  %v3236_v3 = vpop.f32.mrb[117].mxu1  ;;  %v4911_v36 = vmax.f32 %v3935_v8, %v3937_v9 }
 0x1c6   :  { %v1382_v5 = vpop.f32.mrb[118].mxu0  ;;  %v1865_v6 = vpop.f32.mrb[118].mxu1  ;;  %v4912_v8 = vmax.f32 %v3947_v16, %v3949_v20 }
 0x1c7   :  { %2443 = vst.msk [vmem:[%s4786_s6 + $0x18] sm:$0xf] %vm2436_vm4, %v2750_v35  ;;  %v2751_v12 = vpack.c.bf16 %v2193_v18, %v2193_v18  ;;  %v2087_v42 = vmax.f32 %v4908_v41, %v2037_v62  ;;  %v2038_v37 = vmax.f32 %v1382_v5, %v1865_v6  ;;  %v3133_v0 = vpop.f32.mrb[119].mxu0  ;;  %v3237_v48 = vpop.f32.mrb[119].mxu1 }
 0x1c8   :  { %v4913_v48 = vmax.f32 %v3959_v32, %v3961_v33  ;;  %v4914_v32 = vmax.f32 %v3971_v40, %v3973_v44 }
 0x1c9   :  { %2444 = vst.msk [vmem:[%s4786_s6 + $0x1c] sm:$0xf] %vm2436_vm4, %v2751_v12  ;;  %v2144_v22 = vadd.f32 %v4378_v31, %v2087_v42  ;;  %v2088_v55 = vmax.f32 %v4909_v23, %v2038_v37 }
 0x1cb   :  { %v2194_v7 = vmax.f32 %v2144_v22, 0.0  ;;  %v2145_v19 = vadd.f32 %v4378_v31, %v2088_v55 }
 0x1cc   :  { %v1387_v60 = vpop.f32.mrb[120].mxu0  ;;  %v1870_v46 = vpop.f32.mrb[120].mxu1 }
 0x1cd   :  { %v2752_v47 = vpack.c.bf16 %v2194_v7, %v2194_v7  ;;  %v2195_v27 = vmax.f32 %v2145_v19, 0.0  ;;  %v2039_v13 = vmax.f32 %v1387_v60, %v1870_v46  ;;  %v3136_v10 = vpop.f32.mrb[121].mxu0  ;;  %v3240_v29 = vpop.f32.mrb[121].mxu1 }
 0x1ce   :  { %v1390_v30 = vpop.f32.mrb[122].mxu0  ;;  %v1873_v11 = vpop.f32.mrb[122].mxu1 }
 0x1cf   :  { %2445 = vst.msk [vmem:[%s4786_s6 + $0x20] sm:$0xf] %vm2436_vm4, %v2752_v47  ;;  %v2753_v15 = vpack.c.bf16 %v2195_v27, %v2195_v27  ;;  %v2089_v54 = vmax.f32 %v4910_v53, %v2039_v13  ;;  %v2040_v63 = vmax.f32 %v1390_v30, %v1873_v11  ;;  %v3137_v24 = vpop.f32.mrb[123].mxu0  ;;  %v3241_v21 = vpop.f32.mrb[123].mxu1  ;;  %v4915_v53 = vmax.f32 %v3983_v56, %v3985_v57 }
 0x1d0   :  { %v4916_v56 = vmax.f32 %v3995_v4, %v3997_v14 }
 0x1d1   :  { %2446 = vst.msk [vmem:[%s4786_s6 + $0x24] sm:$0xf] %vm2436_vm4, %v2753_v15  ;;  %v2146_v43 = vadd.f32 %v4378_v31, %v2089_v54  ;;  %v2090_v61 = vmax.f32 %v4911_v36, %v2040_v63 }
 0x1d3   :  { %v2196_v17 = vmax.f32 %v2146_v43, 0.0  ;;  %v2147_v34 = vadd.f32 %v4378_v31, %v2090_v61 }
 0x1d4   :  { %v1395_v35 = vpop.f32.mrb[124].mxu0  ;;  %v1878_v58 = vpop.f32.mrb[124].mxu1 }
 0x1d5   :  { %v2754_v59 = vpack.c.bf16 %v2196_v17, %v2196_v17  ;;  %v2197_v18 = vmax.f32 %v2147_v34, 0.0  ;;  %v2041_v62 = vmax.f32 %v1395_v35, %v1878_v58  ;;  %v3140_v1 = vpop.f32.mrb[125].mxu0  ;;  %v3244_v3 = vpop.f32.mrb[125].mxu1 }
 0x1d6   :  { %v1398_v5 = vpop.f32.mrb[126].mxu0  ;;  %v1881_v6 = vpop.f32.mrb[126].mxu1  ;;  %v4917_v3 = vmax.f32 %v4007_v38, %v4009_v39  ;;  %v4918_v38 = vmax.f32 %v4019_v52, %v4021_v2 }
 0x1d7   :  { %2447 = vst.msk [vmem:[%s4786_s6 + $0x28] sm:$0xf] %vm2436_vm4, %v2754_v59  ;;  %v2755_v12 = vpack.c.bf16 %v2197_v18, %v2197_v18  ;;  %v2091_v9 = vmax.f32 %v4912_v8, %v2041_v62  ;;  %v2042_v41 = vmax.f32 %v1398_v5, %v1881_v6  ;;  %v3141_v42 = vpop.f32.mrb[127].mxu0  ;;  %v3245_v37 = vpop.f32.mrb[127].mxu1 }
 0x1d9   :  { %2448 = vst.msk [vmem:[%s4786_s6 + $0x2c] sm:$0xf] %vm2436_vm4, %v2755_v12  ;;  %v2148_v0 = vadd.f32 %v4378_v31, %v2091_v9  ;;  %v2092_v22 = vmax.f32 %v4913_v48, %v2042_v41 }
 0x1db   :  { %v2198_v23 = vmax.f32 %v2148_v0, 0.0  ;;  %v2149_v55 = vadd.f32 %v4378_v31, %v2092_v22 }
 0x1dc   :  { %v1403_v7 = vpop.f32.mrb[128].mxu0  ;;  %v1886_v16 = vpop.f32.mrb[128].mxu1 }
 0x1dd   :  { %v2756_v20 = vpack.c.bf16 %v2198_v23, %v2198_v23  ;;  %v2199_v19 = vmax.f32 %v2149_v55, 0.0  ;;  %v2043_v60 = vmax.f32 %v1403_v7, %v1886_v16  ;;  %v3144_v46 = vpop.f32.mrb[129].mxu0  ;;  %v3248_v47 = vpop.f32.mrb[129].mxu1 }
 0x1de   :  { %v1406_v27 = vpop.f32.mrb[130].mxu0  ;;  %v1889_v13 = vpop.f32.mrb[130].mxu1 }
 0x1df   :  { %2449 = vst.msk [vmem:[%s4786_s6 + $0x30] sm:$0xf] %vm2436_vm4, %v2756_v20  ;;  %v2757_v10 = vpack.c.bf16 %v2199_v19, %v2199_v19  ;;  %v2093_v33 = vmax.f32 %v4914_v32, %v2043_v60  ;;  %v2044_v29 = vmax.f32 %v1406_v27, %v1889_v13  ;;  %v3145_v30 = vpop.f32.mrb[131].mxu0  ;;  %v3249_v11 = vpop.f32.mrb[131].mxu1  ;;  %v4919_v20 = vmax.f32 %v4031_v50, %v4033_v51 }
 0x1e0   :  { %v4920_v50 = vmax.f32 %v4043_v25, %v4045_v26 }
 0x1e1   :  { %2450 = vst.msk [vmem:[%s4786_s6 + $0x34] sm:$0xf] %vm2436_vm4, %v2757_v10  ;;  %v2150_v15 = vadd.f32 %v4378_v31, %v2093_v33  ;;  %v2094_v54 = vmax.f32 %v4915_v53, %v2044_v29 }
 0x1e3   :  { %v2200_v63 = vmax.f32 %v2150_v15, 0.0  ;;  %v2151_v24 = vadd.f32 %v4378_v31, %v2094_v54 }
 0x1e4   :  { %v1411_v21 = vpop.f32.mrb[132].mxu0  ;;  %v1894_v40 = vpop.f32.mrb[132].mxu1 }
 0x1e5   :  { %v2758_v44 = vpack.c.bf16 %v2200_v63, %v2200_v63  ;;  %v2201_v43 = vmax.f32 %v2151_v24, 0.0  ;;  %v2045_v36 = vmax.f32 %v1411_v21, %v1894_v40  ;;  %v3148_v61 = vpop.f32.mrb[133].mxu0  ;;  %v3252_v17 = vpop.f32.mrb[133].mxu1  ;;  %v4921_v63 = vmax.f32 %v4055_v28, %v4057_v45  ;;  %v4922_v45 = vld [vmem:[#allocation2_spill] sm:$0xff] }
 0x1e6   :  { %v1414_v34 = vpop.f32.mrb[134].mxu0  ;;  %v1897_v35 = vpop.f32.mrb[134].mxu1  ;;  %v4923_v28 = vmax.f32 %v4067_v49, %v4922_v45 }
 0x1e7   :  { %2451 = vst.msk [vmem:[%s4786_s6 + $0x38] sm:$0xf] %vm2436_vm4, %v2758_v44  ;;  %v2759_v58 = vpack.c.bf16 %v2201_v43, %v2201_v43  ;;  %v2095_v57 = vmax.f32 %v4916_v56, %v2045_v36  ;;  %v2046_v59 = vmax.f32 %v1414_v34, %v1897_v35  ;;  %v3149_v18 = vpop.f32.mrb[135].mxu0  ;;  %v3253_v62 = vpop.f32.mrb[135].mxu1 }
 0x1e9   :  { %2452 = vst.msk [vmem:[%s4786_s6 + $0x3c] sm:$0xf] %vm2436_vm4, %v2759_v58  ;;  %v2152_v1 = vadd.f32 %v4378_v31, %v2095_v57  ;;  %v2096_v5 = vmax.f32 %v4917_v3, %v2046_v59  ;;  %v4925_v3 = vld [vmem:[#allocation4_spill] sm:$0xff] }
 0x1eb   :  { %v2202_v6 = vmax.f32 %v2152_v1, 0.0  ;;  %v2153_v12 = vadd.f32 %v4378_v31, %v2096_v5  ;;  %v4924_v1 = vld [vmem:[#allocation3_spill] sm:$0xff] }
 0x1ec   :  { %v1419_v8 = vpop.f32.mrb[136].mxu0  ;;  %v1902_v4 = vpop.f32.mrb[136].mxu1  ;;  %v4926_v5 = vmax.f32 %v4924_v1, %v4925_v3  ;;  %v4939_v3 = vld [vmem:[#allocation13_spill] sm:$0xff] }
 0x1ed   :  { %v2760_v14 = vpack.c.bf16 %v2202_v6, %v2202_v6  ;;  %v2203_v9 = vmax.f32 %v2153_v12, 0.0  ;;  %v2047_v41 = vmax.f32 %v1419_v8, %v1902_v4  ;;  %v3152_v42 = vpop.f32.mrb[137].mxu0  ;;  %v3256_v37 = vpop.f32.mrb[137].mxu1 }
 0x1ee   :  { %v1422_v0 = vpop.f32.mrb[138].mxu0  ;;  %v1905_v48 = vpop.f32.mrb[138].mxu1 }
 0x1ef   :  { %2453 = vst.msk [vmem:[%s4786_s6 + $0x40] sm:$0xf] %vm2436_vm4, %v2760_v14  ;;  %v2761_v22 = vpack.c.bf16 %v2203_v9, %v2203_v9  ;;  %v2097_v39 = vmax.f32 %v4918_v38, %v2047_v41  ;;  %v2048_v23 = vmax.f32 %v1422_v0, %v1905_v48  ;;  %v3153_v55 = vpop.f32.mrb[139].mxu0  ;;  %v3257_v7 = vpop.f32.mrb[139].mxu1  ;;  %v4927_v38 = vld [vmem:[#allocation5_spill] sm:$0xff] }
 0x1f1   :  { %2454 = vst.msk [vmem:[%s4786_s6 + $0x44] sm:$0xf] %vm2436_vm4, %v2761_v22  ;;  %v2154_v16 = vadd.f32 %v4378_v31, %v2097_v39  ;;  %v2098_v19 = vmax.f32 %v4919_v20, %v2048_v23  ;;  %v4928_v39 = vld [vmem:[#allocation6_spill] sm:$0xff] }
 0x1f2   :  { %v4929_v23 = vmax.f32 %v4927_v38, %v4928_v39 }
 0x1f3   :  { %v2204_v60 = vmax.f32 %v2154_v16, 0.0  ;;  %v2155_v46 = vadd.f32 %v4378_v31, %v2098_v19 }
 0x1f4   :  { %v1427_v47 = vpop.f32.mrb[140].mxu0  ;;  %v1910_v52 = vpop.f32.mrb[140].mxu1 }
 0x1f5   :  { %v2762_v2 = vpack.c.bf16 %v2204_v60, %v2204_v60  ;;  %v2205_v27 = vmax.f32 %v2155_v46, 0.0  ;;  %v2049_v13 = vmax.f32 %v1427_v47, %v1910_v52  ;;  %v3156_v10 = vpop.f32.mrb[141].mxu0  ;;  %v3260_v32 = vpop.f32.mrb[141].mxu1  ;;  %v4930_v60 = vld [vmem:[#allocation7_spill] sm:$0xff]  ;;  %v4931_v46 = vld [vmem:[#allocation8_spill] sm:$0xff] }
 0x1f6   :  { %v1430_v33 = vpop.f32.mrb[142].mxu0  ;;  %v1913_v29 = vpop.f32.mrb[142].mxu1  ;;  %v4932_v47 = vmax.f32 %v4930_v60, %v4931_v46  ;;  %v4945_v46 = vld [vmem:[#allocation17_spill] sm:$0xff] }
 0x1f7   :  { %2455 = vst.msk [vmem:[%s4786_s6 + $0x48] sm:$0xf] %vm2436_vm4, %v2762_v2  ;;  %v2763_v30 = vpack.c.bf16 %v2205_v27, %v2205_v27  ;;  %v2099_v51 = vmax.f32 %v4920_v50, %v2049_v13  ;;  %v2050_v11 = vmax.f32 %v1430_v33, %v1913_v29  ;;  %v3157_v15 = vpop.f32.mrb[143].mxu0  ;;  %v3261_v53 = vpop.f32.mrb[143].mxu1 }
 0x1f8   :  { %v4933_v53 = vld [vmem:[#allocation9_spill] sm:$0xff] }
 0x1f9   :  { %2456 = vst.msk [vmem:[%s4786_s6 + $0x4c] sm:$0xf] %vm2436_vm4, %v2763_v30  ;;  %v2156_v54 = vadd.f32 %v4378_v31, %v2099_v51  ;;  %v2100_v24 = vmax.f32 %v4921_v63, %v2050_v11 }
 0x1fb   :  { %v2206_v21 = vmax.f32 %v2156_v54, 0.0  ;;  %v2157_v40 = vadd.f32 %v4378_v31, %v2100_v24  ;;  %v4934_v54 = vld [vmem:[#allocation10_spill] sm:$0xff] }
 0x1fc   :  { %v1435_v44 = vpop.f32.mrb[144].mxu0  ;;  %v1918_v25 = vpop.f32.mrb[144].mxu1  ;;  %v4935_v63 = vmax.f32 %v4933_v53, %v4934_v54 }
 0x1fd   :  { %v2764_v26 = vpack.c.bf16 %v2206_v21, %v2206_v21  ;;  %v2207_v43 = vmax.f32 %v2157_v40, 0.0  ;;  %v2051_v36 = vmax.f32 %v1435_v44, %v1918_v25  ;;  %v3160_v61 = vpop.f32.mrb[145].mxu0  ;;  %v3264_v17 = vpop.f32.mrb[145].mxu1 }
 0x1fe   :  { %v1438_v34 = vpop.f32.mrb[146].mxu0  ;;  %v1921_v35 = vpop.f32.mrb[146].mxu1 }
 0x1ff   :  { %2457 = vst.msk [vmem:[%s4786_s6 + $0x50] sm:$0xf] %vm2436_vm4, %v2764_v26  ;;  %v2765_v58 = vpack.c.bf16 %v2207_v43, %v2207_v43  ;;  %v2101_v56 = vmax.f32 %v4923_v28, %v2051_v36  ;;  %v2052_v57 = vmax.f32 %v1438_v34, %v1921_v35  ;;  %v3161_v59 = vpop.f32.mrb[147].mxu0  ;;  %v3265_v18 = vpop.f32.mrb[147].mxu1  ;;  %v4936_v26 = vld [vmem:[#allocation11_spill] sm:$0xff]  ;;  %v4937_v43 = vld [vmem:[#allocation12_spill] sm:$0xff] }
 0x200   :  { %v4938_v36 = vmax.f32 %v4936_v26, %v4937_v43  ;;  %v4951_v43 = vld [vmem:[#allocation21_spill] sm:$0xff] }
 0x201   :  { %2458 = vst.msk [vmem:[%s4786_s6 + $0x54] sm:$0xf] %vm2436_vm4, %v2765_v58  ;;  %v2158_v62 = vadd.f32 %v4378_v31, %v2101_v56  ;;  %v2102_v6 = vmax.f32 %v4926_v5, %v2052_v57  ;;  %v4940_v5 = vld [vmem:[#allocation14_spill] sm:$0xff] }
 0x203   :  { %v2208_v12 = vmax.f32 %v2158_v62, 0.0  ;;  %v2159_v8 = vadd.f32 %v4378_v31, %v2102_v6  ;;  %v4941_v6 = vmax.f32 %v4939_v3, %v4940_v5 }
 0x204   :  { %v1443_v4 = vpop.f32.mrb[148].mxu0  ;;  %v1926_v49 = vpop.f32.mrb[148].mxu1 }
 0x205   :  { %v2766_v14 = vpack.c.bf16 %v2208_v12, %v2208_v12  ;;  %v2209_v9 = vmax.f32 %v2159_v8, 0.0  ;;  %v2053_v41 = vmax.f32 %v1443_v4, %v1926_v49  ;;  %v3164_v42 = vpop.f32.mrb[149].mxu0  ;;  %v3268_v37 = vpop.f32.mrb[149].mxu1 }
 0x206   :  { %v1446_v0 = vpop.f32.mrb[150].mxu0  ;;  %v1929_v48 = vpop.f32.mrb[150].mxu1 }
 0x207   :  { %2459 = vst.msk [vmem:[%s4786_s6 + $0x58] sm:$0xf] %vm2436_vm4, %v2766_v14  ;;  %v2767_v22 = vpack.c.bf16 %v2209_v9, %v2209_v9  ;;  %v2103_v55 = vmax.f32 %v4929_v23, %v2053_v41  ;;  %v2054_v7 = vmax.f32 %v1446_v0, %v1929_v48  ;;  %v3165_v16 = vpop.f32.mrb[151].mxu0  ;;  %v3269_v20 = vpop.f32.mrb[151].mxu1  ;;  %v4942_v9 = vld [vmem:[#allocation15_spill] sm:$0xff]  ;;  %v4943_v41 = vld [vmem:[#allocation16_spill] sm:$0xff] }
 0x208   :  { %v4944_v42 = vmax.f32 %v4942_v9, %v4943_v41  ;;  %v4957_v41 = vld [vmem:[#allocation25_spill] sm:$0xff] }
 0x209   :  { %2460 = vst.msk [vmem:[%s4786_s6 + $0x5c] sm:$0xf] %vm2436_vm4, %v2767_v22  ;;  %v2160_v19 = vadd.f32 %v4378_v31, %v2103_v55  ;;  %v2104_v52 = vmax.f32 %v4932_v47, %v2054_v7  ;;  %v4946_v47 = vld [vmem:[#allocation18_spill] sm:$0xff] }
 0x20b   :  { %v2210_v2 = vmax.f32 %v2160_v19, 0.0  ;;  %v2161_v27 = vadd.f32 %v4378_v31, %v2104_v52  ;;  %v4947_v52 = vmax.f32 %v4945_v46, %v4946_v47 }
 0x20c   :  { %v1451_v13 = vpop.f32.mrb[152].mxu0  ;;  %v1934_v10 = vpop.f32.mrb[152].mxu1 }
 0x20d   :  { %v2768_v32 = vpack.c.bf16 %v2210_v2, %v2210_v2  ;;  %v2211_v33 = vmax.f32 %v2161_v27, 0.0  ;;  %v2055_v29 = vmax.f32 %v1451_v13, %v1934_v10  ;;  %v3168_v30 = vpop.f32.mrb[153].mxu0  ;;  %v3272_v50 = vpop.f32.mrb[153].mxu1 }
 0x20e   :  { %v1454_v51 = vpop.f32.mrb[154].mxu0  ;;  %v1937_v11 = vpop.f32.mrb[154].mxu1 }
 0x20f   :  { %2461 = vst.msk [vmem:[%s4786_s6 + $0x60] sm:$0xf] %vm2436_vm4, %v2768_v32  ;;  %v2769_v15 = vpack.c.bf16 %v2211_v33, %v2211_v33  ;;  %v2105_v24 = vmax.f32 %v4935_v63, %v2055_v29  ;;  %v2056_v21 = vmax.f32 %v1454_v51, %v1937_v11  ;;  %v3169_v40 = vpop.f32.mrb[155].mxu0  ;;  %v3273_v44 = vpop.f32.mrb[155].mxu1  ;;  %v4948_v33 = vld [vmem:[#allocation19_spill] sm:$0xff]  ;;  %v4949_v29 = vld [vmem:[#allocation20_spill] sm:$0xff] }
 0x210   :  { %v4950_v30 = vmax.f32 %v4948_v33, %v4949_v29  ;;  %v4963_v29 = vld [vmem:[#allocation29_spill] sm:$0xff] }
 0x211   :  { %2462 = vst.msk [vmem:[%s4786_s6 + $0x64] sm:$0xf] %vm2436_vm4, %v2769_v15  ;;  %v2162_v25 = vadd.f32 %v4378_v31, %v2105_v24  ;;  %v2106_v61 = vmax.f32 %v4938_v36, %v2056_v21  ;;  %v4952_v36 = vld [vmem:[#allocation22_spill] sm:$0xff] }
 0x213   :  { %v2212_v17 = vmax.f32 %v2162_v25, 0.0  ;;  %v2163_v34 = vadd.f32 %v4378_v31, %v2106_v61  ;;  %v4953_v61 = vmax.f32 %v4951_v43, %v4952_v36 }
 0x214   :  { %v1459_v35 = vpop.f32.mrb[156].mxu0  ;;  %v1942_v58 = vpop.f32.mrb[156].mxu1 }
 0x215   :  { %v2770_v45 = vpack.c.bf16 %v2212_v17, %v2212_v17  ;;  %v2213_v28 = vmax.f32 %v2163_v34, 0.0  ;;  %v2057_v56 = vmax.f32 %v1459_v35, %v1942_v58  ;;  %v3172_v57 = vpop.f32.mrb[157].mxu0  ;;  %v3276_v59 = vpop.f32.mrb[157].mxu1 }
 0x216   :  { %v1462_v18 = vpop.f32.mrb[158].mxu0  ;;  %v1945_v62 = vpop.f32.mrb[158].mxu1 }
 0x217   :  { %2463 = vst.msk [vmem:[%s4786_s6 + $0x68] sm:$0xf] %vm2436_vm4, %v2770_v45  ;;  %v2771_v1 = vpack.c.bf16 %v2213_v28, %v2213_v28  ;;  %v2107_v12 = vmax.f32 %v4941_v6, %v2057_v56  ;;  %v2058_v8 = vmax.f32 %v1462_v18, %v1945_v62  ;;  %v3173_v4 = vpop.f32.mrb[159].mxu0  ;;  %v3277_v49 = vpop.f32.mrb[159].mxu1  ;;  %v4954_v28 = vld [vmem:[#allocation23_spill] sm:$0xff]  ;;  %v4955_v56 = vld [vmem:[#allocation24_spill] sm:$0xff] }
 0x218   :  { %v4956_v57 = vmax.f32 %v4954_v28, %v4955_v56  ;;  %v4969_v56 = vld [vmem:[#allocation33_spill] sm:$0xff] }
 0x219   :  { %2464 = vst.msk [vmem:[%s4786_s6 + $0x6c] sm:$0xf] %vm2436_vm4, %v2771_v1  ;;  %v2164_v14 = vadd.f32 %v4378_v31, %v2107_v12  ;;  %v2108_v37 = vmax.f32 %v4944_v42, %v2058_v8  ;;  %v4958_v42 = vld [vmem:[#allocation26_spill] sm:$0xff] }
 0x21b   :  { %v2214_v0 = vmax.f32 %v2164_v14, 0.0  ;;  %v2165_v48 = vadd.f32 %v4378_v31, %v2108_v37  ;;  %v4959_v37 = vmax.f32 %v4957_v41, %v4958_v42 }
 0x21c   :  { %v1467_v22 = vpop.f32.mrb[160].mxu0  ;;  %v1950_v38 = vpop.f32.mrb[160].mxu1 }
 0x21d   :  { %v2772_v39 = vpack.c.bf16 %v2214_v0, %v2214_v0  ;;  %v2215_v23 = vmax.f32 %v2165_v48, 0.0  ;;  %v2059_v55 = vmax.f32 %v1467_v22, %v1950_v38  ;;  %v3176_v7 = vpop.f32.mrb[161].mxu0  ;;  %v3280_v16 = vpop.f32.mrb[161].mxu1 }
 0x21e   :  { %v1470_v20 = vpop.f32.mrb[162].mxu0  ;;  %v1953_v19 = vpop.f32.mrb[162].mxu1 }
 0x21f   :  { %2465 = vst.msk [vmem:[%s4786_s6 + $0x70] sm:$0xf] %vm2436_vm4, %v2772_v39  ;;  %v2773_v60 = vpack.c.bf16 %v2215_v23, %v2215_v23  ;;  %v2109_v2 = vmax.f32 %v4947_v52, %v2059_v55  ;;  %v2060_v27 = vmax.f32 %v1470_v20, %v1953_v19  ;;  %v3177_v13 = vpop.f32.mrb[163].mxu0  ;;  %v3281_v10 = vpop.f32.mrb[163].mxu1  ;;  %v4960_v23 = vld [vmem:[#allocation27_spill] sm:$0xff]  ;;  %v4961_v55 = vld [vmem:[#allocation28_spill] sm:$0xff] }
 0x220   :  { %v4962_v7 = vmax.f32 %v4960_v23, %v4961_v55  ;;  %v4975_v55 = vld [vmem:[#allocation37_spill] sm:$0xff] }
 0x221   :  { %2466 = vst.msk [vmem:[%s4786_s6 + $0x74] sm:$0xf] %vm2436_vm4, %v2773_v60  ;;  %v2166_v32 = vadd.f32 %v4378_v31, %v2109_v2  ;;  %v2110_v50 = vmax.f32 %v4950_v30, %v2060_v27  ;;  %v4964_v30 = vld [vmem:[#allocation30_spill] sm:$0xff] }
 0x223   :  { %v2216_v51 = vmax.f32 %v2166_v32, 0.0  ;;  %v2167_v11 = vadd.f32 %v4378_v31, %v2110_v50  ;;  %v4965_v50 = vmax.f32 %v4963_v29, %v4964_v30 }
 0x224   :  { %v1475_v15 = vpop.f32.mrb[164].mxu0  ;;  %v1958_v53 = vpop.f32.mrb[164].mxu1 }
 0x225   :  { %v2774_v54 = vpack.c.bf16 %v2216_v51, %v2216_v51  ;;  %v2217_v63 = vmax.f32 %v2167_v11, 0.0  ;;  %v2061_v24 = vmax.f32 %v1475_v15, %v1958_v53  ;;  %v3180_v21 = vpop.f32.mrb[165].mxu0  ;;  %v3284_v40 = vpop.f32.mrb[165].mxu1 }
 0x226   :  { %v1478_v44 = vpop.f32.mrb[166].mxu0  ;;  %v1961_v25 = vpop.f32.mrb[166].mxu1 }
 0x227   :  { %2467 = vst.msk [vmem:[%s4786_s6 + $0x78] sm:$0xf] %vm2436_vm4, %v2774_v54  ;;  %v2775_v26 = vpack.c.bf16 %v2217_v63, %v2217_v63  ;;  %v2111_v17 = vmax.f32 %v4953_v61, %v2061_v24  ;;  %v2062_v34 = vmax.f32 %v1478_v44, %v1961_v25  ;;  %v3181_v35 = vpop.f32.mrb[167].mxu0  ;;  %v3285_v58 = vpop.f32.mrb[167].mxu1  ;;  %v4966_v63 = vld [vmem:[#allocation31_spill] sm:$0xff]  ;;  %v4967_v24 = vld [vmem:[#allocation32_spill] sm:$0xff] }
 0x228   :  { %v4968_v21 = vmax.f32 %v4966_v63, %v4967_v24  ;;  %v4981_v24 = vld [vmem:[#allocation41_spill] sm:$0xff] }
 0x229   :  { %2468 = vst.msk [vmem:[%s4786_s6 + $0x7c] sm:$0xf] %vm2436_vm4, %v2775_v26  ;;  %v2168_v45 = vadd.f32 %v4378_v31, %v2111_v17  ;;  %v2112_v59 = vmax.f32 %v4956_v57, %v2062_v34  ;;  %v4970_v57 = vld [vmem:[#allocation34_spill] sm:$0xff] }
 0x22b   :  { %v2218_v18 = vmax.f32 %v2168_v45, 0.0  ;;  %v2169_v62 = vadd.f32 %v4378_v31, %v2112_v59  ;;  %v4971_v59 = vmax.f32 %v4969_v56, %v4970_v57 }
 0x22c   :  { %v1483_v1 = vpop.f32.mrb[168].mxu0  ;;  %v1966_v3 = vpop.f32.mrb[168].mxu1 }
 0x22d   :  { %v2776_v5 = vpack.c.bf16 %v2218_v18, %v2218_v18  ;;  %v2219_v6 = vmax.f32 %v2169_v62, 0.0  ;;  %v2063_v12 = vmax.f32 %v1483_v1, %v1966_v3  ;;  %v3184_v8 = vpop.f32.mrb[169].mxu0  ;;  %v3288_v4 = vpop.f32.mrb[169].mxu1 }
 0x22e   :  { %v1486_v49 = vpop.f32.mrb[170].mxu0  ;;  %v1969_v14 = vpop.f32.mrb[170].mxu1 }
 0x22f   :  { %2469 = vst.msk [vmem:[%s4786_s6 + $0x80] sm:$0xf] %vm2436_vm4, %v2776_v5  ;;  %v2777_v9 = vpack.c.bf16 %v2219_v6, %v2219_v6  ;;  %v2113_v0 = vmax.f32 %v4959_v37, %v2063_v12  ;;  %v2064_v48 = vmax.f32 %v1486_v49, %v1969_v14  ;;  %v3185_v22 = vpop.f32.mrb[171].mxu0  ;;  %v3289_v38 = vpop.f32.mrb[171].mxu1  ;;  %v4972_v6 = vld [vmem:[#allocation35_spill] sm:$0xff]  ;;  %v4973_v12 = vld [vmem:[#allocation36_spill] sm:$0xff] }
 0x230   :  { %v4974_v8 = vmax.f32 %v4972_v6, %v4973_v12  ;;  %v4987_v12 = vld [vmem:[#allocation45_spill] sm:$0xff] }
 0x231   :  { %2470 = vst.msk [vmem:[%s4786_s6 + $0x84] sm:$0xf] %vm2436_vm4, %v2777_v9  ;;  %v2170_v39 = vadd.f32 %v4378_v31, %v2113_v0  ;;  %v2114_v16 = vmax.f32 %v4962_v7, %v2064_v48  ;;  %v4976_v7 = vld [vmem:[#allocation38_spill] sm:$0xff] }
 0x233   :  { %v2220_v20 = vmax.f32 %v2170_v39, 0.0  ;;  %v2171_v19 = vadd.f32 %v4378_v31, %v2114_v16  ;;  %v4977_v16 = vmax.f32 %v4975_v55, %v4976_v7 }
 0x234   :  { %v1491_v60 = vpop.f32.mrb[172].mxu0  ;;  %v1974_v46 = vpop.f32.mrb[172].mxu1 }
 0x235   :  { %v2778_v47 = vpack.c.bf16 %v2220_v20, %v2220_v20  ;;  %v2221_v52 = vmax.f32 %v2171_v19, 0.0  ;;  %v2065_v2 = vmax.f32 %v1491_v60, %v1974_v46  ;;  %v3188_v27 = vpop.f32.mrb[173].mxu0  ;;  %v3292_v13 = vpop.f32.mrb[173].mxu1 }
 0x236   :  { %v1494_v10 = vpop.f32.mrb[174].mxu0  ;;  %v1977_v32 = vpop.f32.mrb[174].mxu1 }
 0x237   :  { %2471 = vst.msk [vmem:[%s4786_s6 + $0x88] sm:$0xf] %vm2436_vm4, %v2778_v47  ;;  %v2779_v33 = vpack.c.bf16 %v2221_v52, %v2221_v52  ;;  %v2115_v51 = vmax.f32 %v4965_v50, %v2065_v2  ;;  %v2066_v11 = vmax.f32 %v1494_v10, %v1977_v32  ;;  %v3189_v15 = vpop.f32.mrb[175].mxu0  ;;  %v3293_v53 = vpop.f32.mrb[175].mxu1  ;;  %v4978_v52 = vld [vmem:[#allocation39_spill] sm:$0xff]  ;;  %v4979_v2 = vld [vmem:[#allocation40_spill] sm:$0xff] }
 0x238   :  { %v4980_v27 = vmax.f32 %v4978_v52, %v4979_v2  ;;  %v4993_v2 = vld [vmem:[#allocation49_spill] sm:$0xff] }
 0x239   :  { %2472 = vst.msk [vmem:[%s4786_s6 + $0x8c] sm:$0xf] %vm2436_vm4, %v2779_v33  ;;  %v2172_v54 = vadd.f32 %v4378_v31, %v2115_v51  ;;  %v2116_v40 = vmax.f32 %v4968_v21, %v2066_v11  ;;  %v4982_v21 = vld [vmem:[#allocation42_spill] sm:$0xff] }
 0x23b   :  { %v2222_v44 = vmax.f32 %v2172_v54, 0.0  ;;  %v2173_v25 = vadd.f32 %v4378_v31, %v2116_v40  ;;  %v4983_v40 = vmax.f32 %v4981_v24, %v4982_v21 }
 0x23c   :  { %v1499_v26 = vpop.f32.mrb[176].mxu0  ;;  %v1982_v43 = vpop.f32.mrb[176].mxu1 }
 0x23d   :  { %v2780_v36 = vpack.c.bf16 %v2222_v44, %v2222_v44  ;;  %v2223_v61 = vmax.f32 %v2173_v25, 0.0  ;;  %v2067_v17 = vmax.f32 %v1499_v26, %v1982_v43  ;;  %v3192_v34 = vpop.f32.mrb[177].mxu0  ;;  %v3296_v35 = vpop.f32.mrb[177].mxu1 }
 0x23e   :  { %v1502_v58 = vpop.f32.mrb[178].mxu0  ;;  %v1985_v45 = vpop.f32.mrb[178].mxu1 }
 0x23f   :  { %2473 = vst.msk [vmem:[%s4786_s6 + $0x90] sm:$0xf] %vm2436_vm4, %v2780_v36  ;;  %v2781_v28 = vpack.c.bf16 %v2223_v61, %v2223_v61  ;;  %v2117_v18 = vmax.f32 %v4971_v59, %v2067_v17  ;;  %v2068_v62 = vmax.f32 %v1502_v58, %v1985_v45  ;;  %v3193_v1 = vpop.f32.mrb[179].mxu0  ;;  %v3297_v3 = vpop.f32.mrb[179].mxu1  ;;  %v4984_v61 = vld [vmem:[#allocation43_spill] sm:$0xff]  ;;  %v4985_v17 = vld [vmem:[#allocation44_spill] sm:$0xff] }
 0x240   :  { %v4986_v34 = vmax.f32 %v4984_v61, %v4985_v17  ;;  %v4999_v17 = vld [vmem:[#allocation53_spill] sm:$0xff] }
 0x241   :  { %2474 = vst.msk [vmem:[%s4786_s6 + $0x94] sm:$0xf] %vm2436_vm4, %v2781_v28  ;;  %v2174_v5 = vadd.f32 %v4378_v31, %v2117_v18  ;;  %v2118_v4 = vmax.f32 %v4974_v8, %v2068_v62  ;;  %v4988_v8 = vld [vmem:[#allocation46_spill] sm:$0xff] }
 0x243   :  { %v2224_v49 = vmax.f32 %v2174_v5, 0.0  ;;  %v2175_v14 = vadd.f32 %v4378_v31, %v2118_v4  ;;  %v4989_v4 = vmax.f32 %v4987_v12, %v4988_v8 }
 0x244   :  { %v1507_v9 = vpop.f32.mrb[180].mxu0  ;;  %v1990_v41 = vpop.f32.mrb[180].mxu1 }
 0x245   :  { %v2782_v42 = vpack.c.bf16 %v2224_v49, %v2224_v49  ;;  %v2225_v37 = vmax.f32 %v2175_v14, 0.0  ;;  %v2069_v0 = vmax.f32 %v1507_v9, %v1990_v41  ;;  %v3196_v48 = vpop.f32.mrb[181].mxu0  ;;  %v3300_v22 = vpop.f32.mrb[181].mxu1 }
 0x246   :  { %v1510_v38 = vpop.f32.mrb[182].mxu0  ;;  %v1993_v39 = vpop.f32.mrb[182].mxu1 }
 0x247   :  { %2475 = vst.msk [vmem:[%s4786_s6 + $0x98] sm:$0xf] %vm2436_vm4, %v2782_v42  ;;  %v2783_v23 = vpack.c.bf16 %v2225_v37, %v2225_v37  ;;  %v2119_v20 = vmax.f32 %v4977_v16, %v2069_v0  ;;  %v2070_v19 = vmax.f32 %v1510_v38, %v1993_v39  ;;  %v3197_v60 = vpop.f32.mrb[183].mxu0  ;;  %v3301_v46 = vpop.f32.mrb[183].mxu1  ;;  %v4990_v37 = vld [vmem:[#allocation47_spill] sm:$0xff]  ;;  %v4991_v0 = vld [vmem:[#allocation48_spill] sm:$0xff] }
 0x248   :  { %v4992_v48 = vmax.f32 %v4990_v37, %v4991_v0 }
 0x249   :  { %2476 = vst.msk [vmem:[%s4786_s6 + $0x9c] sm:$0xf] %vm2436_vm4, %v2783_v23  ;;  %v2176_v47 = vadd.f32 %v4378_v31, %v2119_v20  ;;  %v2120_v13 = vmax.f32 %v4980_v27, %v2070_v19  ;;  %v4994_v27 = vld [vmem:[#allocation50_spill] sm:$0xff] }
 0x24b   :  { %v2226_v10 = vmax.f32 %v2176_v47, 0.0  ;;  %v2177_v32 = vadd.f32 %v4378_v31, %v2120_v13  ;;  %v4995_v13 = vmax.f32 %v4993_v2, %v4994_v27 }
 0x24c   :  { %v1515_v33 = vpop.f32.mrb[184].mxu0  ;;  %v1998_v29 = vpop.f32.mrb[184].mxu1 }
 0x24d   :  { %v2784_v30 = vpack.c.bf16 %v2226_v10, %v2226_v10  ;;  %v2227_v50 = vmax.f32 %v2177_v32, 0.0  ;;  %v2071_v51 = vmax.f32 %v1515_v33, %v1998_v29  ;;  %v3200_v11 = vpop.f32.mrb[185].mxu0  ;;  %v3304_v15 = vpop.f32.mrb[185].mxu1 }
 0x24e   :  { %v1518_v53 = vpop.f32.mrb[186].mxu0  ;;  %v2001_v54 = vpop.f32.mrb[186].mxu1 }
 0x24f   :  { %2477 = vst.msk [vmem:[%s4786_s6 + $0xa0] sm:$0xf] %vm2436_vm4, %v2784_v30  ;;  %v2785_v63 = vpack.c.bf16 %v2227_v50, %v2227_v50  ;;  %v2121_v44 = vmax.f32 %v4983_v40, %v2071_v51  ;;  %v2072_v25 = vmax.f32 %v1518_v53, %v2001_v54  ;;  %v3201_v26 = vpop.f32.mrb[187].mxu0  ;;  %v3305_v43 = vpop.f32.mrb[187].mxu1  ;;  %v4996_v50 = vld [vmem:[#allocation51_spill] sm:$0xff]  ;;  %v4997_v51 = vld [vmem:[#allocation52_spill] sm:$0xff] }
 0x250   :  { %v4998_v11 = vmax.f32 %v4996_v50, %v4997_v51 }
 0x251   :  { %2478 = vst.msk [vmem:[%s4786_s6 + $0xa4] sm:$0xf] %vm2436_vm4, %v2785_v63  ;;  %v2178_v36 = vadd.f32 %v4378_v31, %v2121_v44  ;;  %v2122_v35 = vmax.f32 %v4986_v34, %v2072_v25  ;;  %v5000_v34 = vld [vmem:[#allocation54_spill] sm:$0xff] }
 0x253   :  { %v2228_v58 = vmax.f32 %v2178_v36, 0.0  ;;  %v2179_v45 = vadd.f32 %v4378_v31, %v2122_v35  ;;  %v5001_v35 = vmax.f32 %v4999_v17, %v5000_v34 }
 0x254   :  { %v1523_v28 = vpop.f32.mrb[188].mxu0  ;;  %v2006_v56 = vpop.f32.mrb[188].mxu1 }
 0x255   :  { %v2786_v57 = vpack.c.bf16 %v2228_v58, %v2228_v58  ;;  %v2229_v59 = vmax.f32 %v2179_v45, 0.0  ;;  %v2073_v18 = vmax.f32 %v1523_v28, %v2006_v56  ;;  %v3204_v62 = vpop.f32.mrb[189].mxu0  ;;  %v3308_v1 = vpop.f32.mrb[189].mxu1 }
 0x256   :  { %v1526_v3 = vpop.f32.mrb[190].mxu0  ;;  %v2009_v5 = vpop.f32.mrb[190].mxu1 }
 0x257   :  { %2479 = vst.msk [vmem:[%s4786_s6 + $0xa8] sm:$0xf] %vm2436_vm4, %v2786_v57  ;;  %v2787_v6 = vpack.c.bf16 %v2229_v59, %v2229_v59  ;;  %v2123_v49 = vmax.f32 %v4989_v4, %v2073_v18  ;;  %v2074_v14 = vmax.f32 %v1526_v3, %v2009_v5  ;;  %v3205_v9 = vpop.f32.mrb[191].mxu0  ;;  %v3309_v41 = vpop.f32.mrb[191].mxu1  ;;  %v5002_v59 = vld [vmem:[#allocation55_spill] sm:$0xff]  ;;  %v5003_v18 = vld [vmem:[#allocation56_spill] sm:$0xff] }
 0x258   :  { %v5004_v62 = vmax.f32 %v5002_v59, %v5003_v18 }
 0x259   :  { %2480 = vst.msk [vmem:[%s4786_s6 + $0xac] sm:$0xf] %vm2436_vm4, %v2787_v6  ;;  %v2180_v42 = vadd.f32 %v4378_v31, %v2123_v49  ;;  %v2124_v22 = vmax.f32 %v4992_v48, %v2074_v14 }
 0x25b   :  { %v2230_v38 = vmax.f32 %v2180_v42, 0.0  ;;  %v2181_v39 = vadd.f32 %v4378_v31, %v2124_v22 }
 0x25c   :  { %v1531_v23 = vpop.f32.mrb[192].mxu0  ;;  %v2014_v55 = vpop.f32.mrb[192].mxu1 }
 0x25d   :  { %v2788_v7 = vpack.c.bf16 %v2230_v38, %v2230_v38  ;;  %v2231_v16 = vmax.f32 %v2181_v39, 0.0  ;;  %v2075_v20 = vmax.f32 %v1531_v23, %v2014_v55  ;;  %v3208_v19 = vpop.f32.mrb[193].mxu0  ;;  %v3312_v60 = vpop.f32.mrb[193].mxu1 }
 0x25e   :  { %v1534_v46 = vpop.f32.mrb[194].mxu0  ;;  %v2017_v47 = vpop.f32.mrb[194].mxu1 }
 0x25f   :  { %2481 = vst.msk [vmem:[%s4786_s6 + $0xb0] sm:$0xf] %vm2436_vm4, %v2788_v7  ;;  %v2789_v52 = vpack.c.bf16 %v2231_v16, %v2231_v16  ;;  %v2125_v10 = vmax.f32 %v4995_v13, %v2075_v20  ;;  %v2076_v32 = vmax.f32 %v1534_v46, %v2017_v47  ;;  %v3209_v33 = vpop.f32.mrb[195].mxu0  ;;  %v3313_v29 = vpop.f32.mrb[195].mxu1 }
 0x261   :  { %2482 = vst.msk [vmem:[%s4786_s6 + $0xb4] sm:$0xf] %vm2436_vm4, %v2789_v52  ;;  %v2182_v30 = vadd.f32 %v4378_v31, %v2125_v10  ;;  %v2126_v15 = vmax.f32 %v4998_v11, %v2076_v32 }
 0x263   :  { %v2232_v53 = vmax.f32 %v2182_v30, 0.0  ;;  %v2183_v54 = vadd.f32 %v4378_v31, %v2126_v15 }
 0x264   :  { %v1539_v63 = vpop.f32.mrb[196].mxu0  ;;  %v2022_v24 = vpop.f32.mrb[196].mxu1 }
 0x265   :  { %v2790_v21 = vpack.c.bf16 %v2232_v53, %v2232_v53  ;;  %v2233_v40 = vmax.f32 %v2183_v54, 0.0  ;;  %v2077_v44 = vmax.f32 %v1539_v63, %v2022_v24  ;;  %v3212_v25 = vpop.f32.mrb[197].mxu0  ;;  %v3316_v26 = vpop.f32.mrb[197].mxu1 }
 0x266   :  { %v1542_v43 = vpop.f32.mrb[198].mxu0  ;;  %v2025_v36 = vpop.f32.mrb[198].mxu1 }
 0x267   :  { %2483 = vst.msk [vmem:[%s4786_s6 + $0xb8] sm:$0xf] %vm2436_vm4, %v2790_v21  ;;  %v2791_v61 = vpack.c.bf16 %v2233_v40, %v2233_v40  ;;  %v2127_v58 = vmax.f32 %v5001_v35, %v2077_v44  ;;  %v2078_v45 = vmax.f32 %v1542_v43, %v2025_v36  ;;  %v3213_v28 = vpop.f32.mrb[199].mxu0  ;;  %v3317_v56 = vpop.f32.mrb[199].mxu1 }
 0x269   :  { %2484 = vst.msk [vmem:[%s4786_s6 + $0xbc] sm:$0xf] %vm2436_vm4, %v2791_v61  ;;  %v2184_v57 = vadd.f32 %v4378_v31, %v2127_v58  ;;  %v2128_v1 = vmax.f32 %v5004_v62, %v2078_v45 }
 0x26b   :  { %v2234_v3 = vmax.f32 %v2184_v57, 0.0  ;;  %v2185_v5 = vadd.f32 %v4378_v31, %v2128_v1 }
 0x26d   :  { %v2792_v6 = vpack.c.bf16 %v2234_v3, %v2234_v3  ;;  %v2235_v12 = vmax.f32 %v2185_v5, 0.0 }
 0x26f   :  { %2485 = vst.msk [vmem:[%s4786_s6 + $0xc0] sm:$0xf] %vm2436_vm4, %v2792_v6  ;;  %v2793_v8 = vpack.c.bf16 %v2235_v12, %v2235_v12 }
 0x271   :  { %2486 = vst.msk [vmem:[%s4786_s6 + $0xc4] sm:$0xf] %vm2436_vm4, %v2793_v8 }

// kernel: forward.4
= control target key start
LH: loop header
LB: loop body
LE: loop exit
PB: predicated region body
PF: predicated region fallthrough
CT: control target
= control target key end

     0   :  { %v815_v0 = vmov 0   ;;  %vm144_vm0 = vcmask 179200   ;;  %vm157_vm1 = vcmask 1042432   ;;  %vm668_vm2 = vcmask 125952   ;;  %s1174_s4 = inlined_call_operand.vmem [shape: bf16[150,16], index: 4, kind: input, shape index: {}]   ;;  %s1175_s0 = inlined_call_operand.vmem [shape: bf16[64,150], index: 0, kind: input, shape index: {}]   ;;  %s1176_s1 = inlined_call_operand.vmem [shape: bf16[64,150], index: 1, kind: input, shape index: {}]   ;;  %s1177_s2 = inlined_call_operand.vmem [shape: bf16[64,150], index: 2, kind: input, shape index: {}]   ;;  %s1178_s3 = inlined_call_operand.vmem [shape: bf16[64,150], index: 3, kind: input, shape index: {}]   ;;  %s1179_s5 = inlined_call_operand.vmem [shape: f32[1,16], index: 5, kind: input, shape index: {}]   ;;  %s1180_s6 = inlined_call_operand.vmem [shape: bf16[64,16], index: 6, kind: output, shape index: {}]  }
   0x1   :  { %161 = vmatprep.subr.bf16.mxu0 %v815_v0  ;;  %282 = vmatprep.subr.bf16.mxu1 %v815_v0  ;;  %v856_v1 = vld [vmem:[%s1174_s4] sm:$0xff]   ;;  %v863_v2 = vld [vmem:[%s1174_s4 + $0x8] sm:$0xff]   ;;  %v872_v3 = vld [vmem:[%s1174_s4 + $0x10] sm:$0xff]  }
   0x2   :  { %162 = vmatpush1.bf16.msra.mxu0 %v856_v1  ;;  %283 = vmatpush1.bf16.msra.mxu1 %v856_v1  ;;  %v881_v4 = vld [vmem:[%s1174_s4 + $0x18] sm:$0xff]   ;;  %v769_v5 = vld [vmem:[%s1175_s0 + $0x4] ss:$8 sps:$4 sm:$0xff]   ;;  %v916_v9 = vld [vmem:[%s1174_s4 + $0x30] sm:$0xff]  }
   0x3   :  { %163 = vmatprep.subr.bf16.mxu0 %v815_v0  ;;  %284 = vmatprep.subr.bf16.mxu1 %v815_v0  ;;  %v772_v6 = vld [vmem:[%s1176_s1 + $0x4] ss:$8 sps:$4 sm:$0xff]   ;;  %v925_v10 = vld [vmem:[%s1174_s4 + $0x38] sm:$0xff]   ;;  %v766_v12 = vld [vmem:[%s1174_s4 + $0x48] ss:$0 sps:$4 sm:$0x77]  }
   0x4   :  { %699 = vmatprep.mubr.msk.bf16.mxu0 %vm144_vm0, %v769_v5  ;;  %v897_v7 = vld [vmem:[%s1174_s4 + $0x20] sm:$0xff]   ;;  %711 = vmatprep.mubr.msk.bf16.mxu1 %vm144_vm0, %v772_v6  ;;  %v907_v8 = vld [vmem:[%s1174_s4 + $0x28] sm:$0xff]   ;;  %v945_v13 = vsel %vm157_vm1, %v766_v12, 0  ;;  %v773_v16 = vld [vmem:[%s1175_s0 + $0x14] ss:$8 sps:$4 sm:$0xff]  }
   0x5   :  { %v934_v11 = vld [vmem:[%s1174_s4 + $0x40] sm:$0xff]   ;;  %v775_v17 = vld [vmem:[%s1176_s1 + $0x14] ss:$8 sps:$4 sm:$0xff]   ;;  %v777_v18 = vld [vmem:[%s1175_s0 + $0x10] ss:$8 sps:$4 sm:$0xff]  }
   0x6   :  { %164 = vmatpush1.bf16.msra.mxu0 %v863_v2  ;;  %285 = vmatpush1.bf16.msra.mxu1 %v863_v2  ;;  %v767_v14 = vld [vmem:[%s1175_s0] ss:$8 sps:$4 sm:$0xff]   ;;  %v778_v19 = vld [vmem:[%s1176_s1 + $0x10] ss:$8 sps:$4 sm:$0xff]   ;;  %v779_v20 = vld [vmem:[%s1175_s0 + $0x24] ss:$8 sps:$4 sm:$0xff]  }
   0x7   :  { %165 = vmatprep.subr.bf16.mxu0 %v815_v0  ;;  %286 = vmatprep.subr.bf16.mxu1 %v815_v0  ;;  %v770_v15 = vld [vmem:[%s1176_s1] ss:$8 sps:$4 sm:$0xff]   ;;  %v781_v21 = vld [vmem:[%s1176_s1 + $0x24] ss:$8 sps:$4 sm:$0xff]   ;;  %v785_v24 = vld [vmem:[%s1175_s0 + $0x34] ss:$8 sps:$4 sm:$0xff]  }
   0x8   :  { %v783_v22 = vld [vmem:[%s1175_s0 + $0x20] ss:$8 sps:$4 sm:$0xff]   ;;  %v787_v25 = vld [vmem:[%s1176_s1 + $0x34] ss:$8 sps:$4 sm:$0xff]   ;;  %v789_v26 = vld [vmem:[%s1175_s0 + $0x30] ss:$8 sps:$4 sm:$0xff]  }
   0x9   :  { %v784_v23 = vld [vmem:[%s1176_s1 + $0x20] ss:$8 sps:$4 sm:$0xff]   ;;  %v790_v27 = vld [vmem:[%s1176_s1 + $0x30] ss:$8 sps:$4 sm:$0xff]   ;;  %v793_v28 = vld [vmem:[%s1177_s2 + $0x4] ss:$8 sps:$4 sm:$0xff]  }
   0xa   :  { %166 = vmatpush1.bf16.msra.mxu0 %v872_v3  ;;  %287 = vmatpush1.bf16.msra.mxu1 %v872_v3  ;;  %v796_v29 = vld [vmem:[%s1178_s3 + $0x4] ss:$8 sps:$4 sm:$0xff]   ;;  %v791_v30 = vld [vmem:[%s1177_s2] ss:$8 sps:$4 sm:$0xff]   ;;  %v797_v32 = vld [vmem:[%s1177_s2 + $0x14] ss:$8 sps:$4 sm:$0xff]  }
   0xb   :  { %167 = vmatprep.subr.bf16.mxu0 %v815_v0  ;;  %288 = vmatprep.subr.bf16.mxu1 %v815_v0  ;;  %v794_v31 = vld [vmem:[%s1178_s3] ss:$8 sps:$4 sm:$0xff]   ;;  %v799_v33 = vld [vmem:[%s1178_s3 + $0x14] ss:$8 sps:$4 sm:$0xff]   ;;  %v801_v34 = vld [vmem:[%s1177_s2 + $0x10] ss:$8 sps:$4 sm:$0xff]  }
   0xc   :  { %v802_v35 = vld [vmem:[%s1178_s3 + $0x10] ss:$8 sps:$4 sm:$0xff]   ;;  %v803_v36 = vld [vmem:[%s1177_s2 + $0x24] ss:$8 sps:$4 sm:$0xff]   ;;  %v807_v38 = vld [vmem:[%s1177_s2 + $0x20] ss:$8 sps:$4 sm:$0xff]  }
   0xd   :  { %v805_v37 = vld [vmem:[%s1178_s3 + $0x24] ss:$8 sps:$4 sm:$0xff]   ;;  %v808_v39 = vld [vmem:[%s1178_s3 + $0x20] ss:$8 sps:$4 sm:$0xff]   ;;  %v809_v40 = vld [vmem:[%s1177_s2 + $0x34] ss:$8 sps:$4 sm:$0xff]  }
   0xe   :  { %168 = vmatpush1.bf16.msra.mxu0 %v881_v4  ;;  %289 = vmatpush1.bf16.msra.mxu1 %v881_v4  ;;  %v811_v41 = vld [vmem:[%s1178_s3 + $0x34] ss:$8 sps:$4 sm:$0xff]   ;;  %v813_v42 = vld [vmem:[%s1177_s2 + $0x30] ss:$8 sps:$4 sm:$0xff]  }
   0xf   :  { %169 = vmatprep.subr.bf16.mxu0 %v815_v0  ;;  %290 = vmatprep.subr.bf16.mxu1 %v815_v0  ;;  %v814_v43 = vld [vmem:[%s1178_s3 + $0x30] ss:$8 sps:$4 sm:$0xff]  }
  0x12   :  { %170 = vmatpush1.bf16.msra.mxu0 %v897_v7  ;;  %291 = vmatpush1.bf16.msra.mxu1 %v897_v7 }
  0x13   :  { %171 = vmatprep.subr.bf16.mxu0 %v815_v0  ;;  %292 = vmatprep.subr.bf16.mxu1 %v815_v0 }
  0x16   :  { %172 = vmatpush1.bf16.msra.mxu0 %v907_v8  ;;  %293 = vmatpush1.bf16.msra.mxu1 %v907_v8 }
  0x17   :  { %173 = vmatprep.subr.bf16.mxu0 %v815_v0  ;;  %294 = vmatprep.subr.bf16.mxu1 %v815_v0 }
  0x1a   :  { %174 = vmatpush1.bf16.msra.mxu0 %v916_v9  ;;  %295 = vmatpush1.bf16.msra.mxu1 %v916_v9 }
  0x1b   :  { %175 = vmatprep.subr.bf16.mxu0 %v815_v0  ;;  %296 = vmatprep.subr.bf16.mxu1 %v815_v0 }
  0x1e   :  { %176 = vmatpush1.bf16.msra.mxu0 %v925_v10  ;;  %297 = vmatpush1.bf16.msra.mxu1 %v925_v10 }
  0x1f   :  { %177 = vmatprep.subr.bf16.mxu0 %v815_v0  ;;  %298 = vmatprep.subr.bf16.mxu1 %v815_v0 }
  0x22   :  { %178 = vmatpush1.bf16.msra.mxu0 %v934_v11  ;;  %299 = vmatpush1.bf16.msra.mxu1 %v934_v11 }
  0x23   :  { %179 = vmatprep.subr.bf16.mxu0 %v815_v0  ;;  %300 = vmatprep.subr.bf16.mxu1 %v815_v0 }
  0x26   :  { %180 = vmatpush1.bf16.msra.mxu0 %v945_v13  ;;  %301 = vmatpush1.bf16.msra.mxu1 %v945_v13 }
  0x27   :  { %411 = vmatprep.subr.bf16.mxu0 %v815_v0  ;;  %532 = vmatprep.subr.bf16.mxu1 %v815_v0 }
  0x29   :  { %194 = vmatmul.mubr.bf16.vlgmr.msra.gmra.mrb[0].mxu0 %v767_v14  ;;  %315 = vmatmul.mubr.bf16.vlgmr.msra.gmra.mrb[0].mxu1 %v770_v15 }
  0x2a   :  { %412 = vmatpush1.bf16.msra.mxu0 %v856_v1  ;;  %533 = vmatpush1.bf16.msra.mxu1 %v856_v1 }
  0x2b   :  { %413 = vmatprep.subr.bf16.mxu0 %v815_v0  ;;  %534 = vmatprep.subr.bf16.mxu1 %v815_v0 }
  0x2c   :  { %700 = vmatprep.mubr.msk.bf16.mxu0 %vm144_vm0, %v773_v16  ;;  %712 = vmatprep.mubr.msk.bf16.mxu1 %vm144_vm0, %v775_v17 }
  0x2e   :  { %414 = vmatpush1.bf16.msra.mxu0 %v863_v2  ;;  %535 = vmatpush1.bf16.msra.mxu1 %v863_v2 }
  0x2f   :  { %415 = vmatprep.subr.bf16.mxu0 %v815_v0  ;;  %536 = vmatprep.subr.bf16.mxu1 %v815_v0 }
  0x31   :  { %202 = vmatmul.mubr.bf16.gmra.mrb[4].mxu0 %v777_v18  ;;  %323 = vmatmul.mubr.bf16.gmra.mrb[4].mxu1 %v778_v19 }
  0x32   :  { %416 = vmatpush1.bf16.msra.mxu0 %v872_v3  ;;  %537 = vmatpush1.bf16.msra.mxu1 %v872_v3 }
  0x33   :  { %417 = vmatprep.subr.bf16.mxu0 %v815_v0  ;;  %538 = vmatprep.subr.bf16.mxu1 %v815_v0 }
  0x34   :  { %701 = vmatprep.mubr.msk.bf16.mxu0 %vm144_vm0, %v779_v20  ;;  %713 = vmatprep.mubr.msk.bf16.mxu1 %vm144_vm0, %v781_v21 }
  0x36   :  { %418 = vmatpush1.bf16.msra.mxu0 %v881_v4  ;;  %539 = vmatpush1.bf16.msra.mxu1 %v881_v4 }
  0x37   :  { %419 = vmatprep.subr.bf16.mxu0 %v815_v0  ;;  %540 = vmatprep.subr.bf16.mxu1 %v815_v0 }
  0x39   :  { %210 = vmatmul.mubr.bf16.gmra.mrb[8].mxu0 %v783_v22  ;;  %331 = vmatmul.mubr.bf16.gmra.mrb[8].mxu1 %v784_v23 }
  0x3a   :  { %420 = vmatpush1.bf16.msra.mxu0 %v897_v7  ;;  %541 = vmatpush1.bf16.msra.mxu1 %v897_v7 }
  0x3b   :  { %421 = vmatprep.subr.bf16.mxu0 %v815_v0  ;;  %542 = vmatprep.subr.bf16.mxu1 %v815_v0 }
  0x3c   :  { %702 = vmatprep.mubr.msk.bf16.mxu0 %vm144_vm0, %v785_v24  ;;  %714 = vmatprep.mubr.msk.bf16.mxu1 %vm144_vm0, %v787_v25  ;;  %v1120_v25 = vld [vmem:[%s1179_s5] ss:$0 sm:$0xff] }
  0x3e   :  { %422 = vmatpush1.bf16.msra.mxu0 %v907_v8  ;;  %543 = vmatpush1.bf16.msra.mxu1 %v907_v8 }
  0x3f   :  { %423 = vmatprep.subr.bf16.mxu0 %v815_v0  ;;  %544 = vmatprep.subr.bf16.mxu1 %v815_v0 }
  0x41   :  { %218 = vmatmul.mubr.bf16.gmra.mrb[12].mxu0 %v789_v26  ;;  %339 = vmatmul.mubr.bf16.gmra.mrb[12].mxu1 %v790_v27 }
  0x42   :  { %424 = vmatpush1.bf16.msra.mxu0 %v916_v9  ;;  %545 = vmatpush1.bf16.msra.mxu1 %v916_v9 }
  0x43   :  { %425 = vmatprep.subr.bf16.mxu0 %v815_v0  ;;  %546 = vmatprep.subr.bf16.mxu1 %v815_v0 }
  0x44   :  { %723 = vmatprep.mubr.msk.bf16.mxu0 %vm144_vm0, %v793_v28  ;;  %735 = vmatprep.mubr.msk.bf16.mxu1 %vm144_vm0, %v796_v29 }
  0x46   :  { %426 = vmatpush1.bf16.msra.mxu0 %v925_v10  ;;  %547 = vmatpush1.bf16.msra.mxu1 %v925_v10 }
  0x47   :  { %427 = vmatprep.subr.bf16.mxu0 %v815_v0  ;;  %548 = vmatprep.subr.bf16.mxu1 %v815_v0 }
  0x4a   :  { %428 = vmatpush1.bf16.msra.mxu0 %v934_v11  ;;  %549 = vmatpush1.bf16.msra.mxu1 %v934_v11 }
  0x4b   :  { %429 = vmatprep.subr.bf16.mxu0 %v815_v0  ;;  %550 = vmatprep.subr.bf16.mxu1 %v815_v0 }
  0x4e   :  { %430 = vmatpush1.bf16.msra.mxu0 %v945_v13  ;;  %551 = vmatpush1.bf16.msra.mxu1 %v945_v13 }
  0x51   :  { %444 = vmatmul.mubr.bf16.vlgmr.msra.gmra.mrb[16].mxu0 %v791_v30  ;;  %565 = vmatmul.mubr.bf16.vlgmr.msra.gmra.mrb[16].mxu1 %v794_v31 }
  0x52   :  { %724 = vmatprep.mubr.msk.bf16.mxu0 %vm144_vm0, %v797_v32  ;;  %736 = vmatprep.mubr.msk.bf16.mxu1 %vm144_vm0, %v799_v33 }
  0x59   :  { %452 = vmatmul.mubr.bf16.gmra.mrb[20].mxu0 %v801_v34  ;;  %573 = vmatmul.mubr.bf16.gmra.mrb[20].mxu1 %v802_v35 }
  0x5a   :  { %725 = vmatprep.mubr.msk.bf16.mxu0 %vm144_vm0, %v803_v36  ;;  %737 = vmatprep.mubr.msk.bf16.mxu1 %vm144_vm0, %v805_v37 }
  0x61   :  { %460 = vmatmul.mubr.bf16.gmra.mrb[24].mxu0 %v807_v38  ;;  %581 = vmatmul.mubr.bf16.gmra.mrb[24].mxu1 %v808_v39 }
  0x62   :  { %726 = vmatprep.mubr.msk.bf16.mxu0 %vm144_vm0, %v809_v40  ;;  %738 = vmatprep.mubr.msk.bf16.mxu1 %vm144_vm0, %v811_v41 }
  0x69   :  { %468 = vmatmul.mubr.bf16.gmra.mrb[28].mxu0 %v813_v42  ;;  %589 = vmatmul.mubr.bf16.gmra.mrb[28].mxu1 %v814_v43 }
  0xfc   :  { %v195_v44 = vpop.f32.mrb[0].mxu0  ;;  %v316_v45 = vpop.f32.mrb[0].mxu1 }
  0xfd   :  { %v347_v46 = vmax.f32 %v195_v44, %v316_v45  ;;  %v197_v47 = vpop.f32.mrb[1].mxu0  ;;  %v318_v48 = vpop.f32.mrb[1].mxu1 }
  0xfe   :  { %v198_v49 = vpop.f32.mrb[2].mxu0  ;;  %v319_v50 = vpop.f32.mrb[2].mxu1 }
  0xff   :  { %v348_v51 = vmax.f32 %v198_v49, %v319_v50  ;;  %v200_v52 = vpop.f32.mrb[3].mxu0  ;;  %v321_v53 = vpop.f32.mrb[3].mxu1 }
 0x104   :  { %v203_v54 = vpop.f32.mrb[4].mxu0  ;;  %v324_v55 = vpop.f32.mrb[4].mxu1 }
 0x105   :  { %v349_v56 = vmax.f32 %v203_v54, %v324_v55  ;;  %v205_v57 = vpop.f32.mrb[5].mxu0  ;;  %v326_v58 = vpop.f32.mrb[5].mxu1 }
 0x106   :  { %v206_v59 = vpop.f32.mrb[6].mxu0  ;;  %v327_v60 = vpop.f32.mrb[6].mxu1 }
 0x107   :  { %v350_v61 = vmax.f32 %v206_v59, %v327_v60  ;;  %v208_v62 = vpop.f32.mrb[7].mxu0  ;;  %v329_v63 = vpop.f32.mrb[7].mxu1 }
 0x10c   :  { %v1093_v0 = vpop.f32.mrb[8].mxu0  ;;  %v1095_v1 = vpop.f32.mrb[8].mxu1 }
 0x10d   :  { %v351_v2 = vmax.f32 %v1093_v0, %v1095_v1  ;;  %v213_v3 = vpop.f32.mrb[9].mxu0  ;;  %v334_v4 = vpop.f32.mrb[9].mxu1 }
 0x10e   :  { %v1099_v5 = vpop.f32.mrb[10].mxu0  ;;  %v1101_v6 = vpop.f32.mrb[10].mxu1 }
 0x10f   :  { %v352_v7 = vmax.f32 %v1099_v5, %v1101_v6  ;;  %v216_v8 = vpop.f32.mrb[11].mxu0  ;;  %v337_v9 = vpop.f32.mrb[11].mxu1 }
 0x114   :  { %v1105_v10 = vpop.f32.mrb[12].mxu0  ;;  %v1107_v11 = vpop.f32.mrb[12].mxu1 }
 0x115   :  { %v353_v12 = vmax.f32 %v1105_v10, %v1107_v11  ;;  %v221_v13 = vpop.f32.mrb[13].mxu0  ;;  %v342_v14 = vpop.f32.mrb[13].mxu1 }
 0x116   :  { %v1111_v15 = vpop.f32.mrb[14].mxu0  ;;  %v1113_v16 = vpop.f32.mrb[14].mxu1 }
 0x117   :  { %v354_v17 = vmax.f32 %v1111_v15, %v1113_v16  ;;  %v224_v18 = vpop.f32.mrb[15].mxu0  ;;  %v345_v19 = vpop.f32.mrb[15].mxu1 }
 0x124   :  { %v445_v20 = vpop.f32.mrb[16].mxu0  ;;  %v566_v21 = vpop.f32.mrb[16].mxu1 }
 0x125   :  { %v597_v22 = vmax.f32 %v445_v20, %v566_v21  ;;  %v447_v23 = vpop.f32.mrb[17].mxu0  ;;  %v568_v24 = vpop.f32.mrb[17].mxu1 }
 0x126   :  { %v448_v26 = vpop.f32.mrb[18].mxu0  ;;  %v569_v27 = vpop.f32.mrb[18].mxu1 }
 0x127   :  { %v605_v28 = vmax.f32 %v347_v46, %v597_v22  ;;  %v598_v29 = vmax.f32 %v448_v26, %v569_v27  ;;  %v450_v30 = vpop.f32.mrb[19].mxu0  ;;  %v571_v31 = vpop.f32.mrb[19].mxu1 }
 0x129   :  { %v620_v32 = vadd.f32 %v1120_v25, %v605_v28  ;;  %v606_v33 = vmax.f32 %v348_v51, %v598_v29 }
 0x12b   :  { %v628_v34 = vmax.f32 %v620_v32, 0.0  ;;  %v621_v35 = vadd.f32 %v1120_v25, %v606_v33 }
 0x12c   :  { %v453_v36 = vpop.f32.mrb[20].mxu0  ;;  %v574_v37 = vpop.f32.mrb[20].mxu1 }
 0x12d   :  { %v748_v38 = vpack.c.bf16 %v628_v34, %v628_v34  ;;  %v629_v39 = vmax.f32 %v621_v35, 0.0  ;;  %v599_v40 = vmax.f32 %v453_v36, %v574_v37  ;;  %v455_v41 = vpop.f32.mrb[21].mxu0  ;;  %v576_v42 = vpop.f32.mrb[21].mxu1 }
 0x12e   :  { %v456_v43 = vpop.f32.mrb[22].mxu0  ;;  %v577_v44 = vpop.f32.mrb[22].mxu1 }
 0x12f   :  { %669 = vst.msk [vmem:[%s1180_s6] sm:$0xf] %vm668_vm2, %v748_v38  ;;  %v749_v45 = vpack.c.bf16 %v629_v39, %v629_v39  ;;  %v607_v46 = vmax.f32 %v349_v56, %v599_v40  ;;  %v600_v47 = vmax.f32 %v456_v43, %v577_v44  ;;  %v458_v48 = vpop.f32.mrb[23].mxu0  ;;  %v579_v49 = vpop.f32.mrb[23].mxu1 }
 0x131   :  { %670 = vst.msk [vmem:[%s1180_s6 + $0x4] sm:$0xf] %vm668_vm2, %v749_v45  ;;  %v622_v50 = vadd.f32 %v1120_v25, %v607_v46  ;;  %v608_v51 = vmax.f32 %v350_v61, %v600_v47 }
 0x133   :  { %v630_v52 = vmax.f32 %v622_v50, 0.0  ;;  %v623_v53 = vadd.f32 %v1120_v25, %v608_v51 }
 0x134   :  { %v461_v54 = vpop.f32.mrb[24].mxu0  ;;  %v582_v55 = vpop.f32.mrb[24].mxu1 }
 0x135   :  { %v750_v57 = vpack.c.bf16 %v630_v52, %v630_v52  ;;  %v631_v58 = vmax.f32 %v623_v53, 0.0  ;;  %v601_v59 = vmax.f32 %v461_v54, %v582_v55  ;;  %v463_v56 = vpop.f32.mrb[25].mxu0  ;;  %v584_v60 = vpop.f32.mrb[25].mxu1 }
 0x136   :  { %v464_v62 = vpop.f32.mrb[26].mxu0  ;;  %v585_v63 = vpop.f32.mrb[26].mxu1 }
 0x137   :  { %671 = vst.msk [vmem:[%s1180_s6 + $0x8] sm:$0xf] %vm668_vm2, %v750_v57  ;;  %v751_v3 = vpack.c.bf16 %v631_v58, %v631_v58  ;;  %v609_v61 = vmax.f32 %v351_v2, %v601_v59  ;;  %v602_v4 = vmax.f32 %v464_v62, %v585_v63  ;;  %v466_v8 = vpop.f32.mrb[27].mxu0  ;;  %v587_v9 = vpop.f32.mrb[27].mxu1 }
 0x139   :  { %672 = vst.msk [vmem:[%s1180_s6 + $0xc] sm:$0xf] %vm668_vm2, %v751_v3  ;;  %v624_v13 = vadd.f32 %v1120_v25, %v609_v61  ;;  %v610_v14 = vmax.f32 %v352_v7, %v602_v4 }
 0x13b   :  { %v632_v18 = vmax.f32 %v624_v13, 0.0  ;;  %v625_v19 = vadd.f32 %v1120_v25, %v610_v14 }
 0x13c   :  { %v469_v20 = vpop.f32.mrb[28].mxu0  ;;  %v590_v0 = vpop.f32.mrb[28].mxu1 }
 0x13d   :  { %v752_v1 = vpack.c.bf16 %v632_v18, %v632_v18  ;;  %v633_v2 = vmax.f32 %v625_v19, 0.0  ;;  %v603_v21 = vmax.f32 %v469_v20, %v590_v0  ;;  %v471_v22 = vpop.f32.mrb[29].mxu0  ;;  %v592_v23 = vpop.f32.mrb[29].mxu1 }
 0x13e   :  { %v472_v24 = vpop.f32.mrb[30].mxu0  ;;  %v593_v26 = vpop.f32.mrb[30].mxu1 }
 0x13f   :  { %673 = vst.msk [vmem:[%s1180_s6 + $0x10] sm:$0xf] %vm668_vm2, %v752_v1  ;;  %v753_v27 = vpack.c.bf16 %v633_v2, %v633_v2  ;;  %v611_v5 = vmax.f32 %v353_v12, %v603_v21  ;;  %v604_v6 = vmax.f32 %v472_v24, %v593_v26  ;;  %v474_v7 = vpop.f32.mrb[31].mxu0  ;;  %v595_v28 = vpop.f32.mrb[31].mxu1 }
 0x141   :  { %674 = vst.msk [vmem:[%s1180_s6 + $0x14] sm:$0xf] %vm668_vm2, %v753_v27  ;;  %v626_v29 = vadd.f32 %v1120_v25, %v611_v5  ;;  %v612_v30 = vmax.f32 %v354_v17, %v604_v6 }
 0x143   :  { %v634_v31 = vmax.f32 %v626_v29, 0.0  ;;  %v627_v32 = vadd.f32 %v1120_v25, %v612_v30 }
 0x145   :  { %v754_v33 = vpack.c.bf16 %v634_v31, %v634_v31  ;;  %v635_v10 = vmax.f32 %v627_v32, 0.0 }
 0x147   :  { %675 = vst.msk [vmem:[%s1180_s6 + $0x18] sm:$0xf] %vm668_vm2, %v754_v33  ;;  %v755_v11 = vpack.c.bf16 %v635_v10, %v635_v10 }
 0x149   :  { %676 = vst.msk [vmem:[%s1180_s6 + $0x1c] sm:$0xf] %vm668_vm2, %v755_v11 }

// kernel: forward.5
= control target key start
LH: loop header
LB: loop body
LE: loop exit
PB: predicated region body
PF: predicated region fallthrough
CT: control target
= control target key end

     0   :  { %v775_v0 = vmov 0   ;;  %vm257_vm0 = vcmask 130048   ;;  %v776_v30 = vmov 0.0   ;;  %vm417_vm1 = vcmask 1043456   ;;  %s993_s1 = inlined_call_operand.vmem [shape: bf16[400,120], index: 1, kind: input, shape index: {}]   ;;  %s994_s0 = inlined_call_operand.vmem [shape: bf16[16,400], index: 0, kind: input, shape index: {}]   ;;  %s995_s3 = inlined_call_operand.vmem [shape: bf16[120,84], index: 3, kind: input, shape index: {}]   ;;  %s996_s5 = inlined_call_operand.vmem [shape: bf16[84,10], index: 5, kind: input, shape index: {}]   ;;  %s997_s2 = inlined_call_operand.vmem [shape: f32[1,120], index: 2, kind: input, shape index: {}]   ;;  %s998_s4 = inlined_call_operand.vmem [shape: f32[1,84], index: 4, kind: input, shape index: {}]   ;;  %s999_s6 = inlined_call_operand.vmem [shape: f32[1,10], index: 6, kind: input, shape index: {}]   ;;  %s1000_s7 = inlined_call_operand.vmem [shape: f32[16,10], index: 7, kind: output, shape index: {}]  }
   0x1   :  { %302 = vmatprep.subr.bf16.mxu1 %v775_v0  ;;  %v722_v1 = vld [vmem:[%s993_s1 + $0x40] sm:$0xff]   ;;  %v725_v4 = vld [vmem:[%s993_s1 + $0x48] sm:$0xff]   ;;  %v728_v7 = vld [vmem:[%s993_s1 + $0x50] sm:$0xff]   ;;  %vm777_vm2 = vmmov 0   ;;  %vm413_vm3 = vcmask 982016   ;;  %vm520_vm4 = vcmask 1041408  }
   0x2   :  { %v723_v2 = vld [vmem:[%s993_s1 + $0x80] sm:$0xff]   ;;  %645 = vmatprep.subr.bf16.mxu0 %v722_v1  ;;  %v726_v5 = vld [vmem:[%s993_s1 + $0x88] sm:$0xff]   ;;  %v729_v8 = vld [vmem:[%s993_s1 + $0x90] sm:$0xff]   ;;  %vm516_vm5 = vcmask 687104   ;;  %vm565_vm6 = vcmask 80896  }
   0x3   :  { %v724_v3 = vld [vmem:[%s993_s1] sm:$0xff]   ;;  %303 = vmatpush1.bf16.msra.mxu1 %v723_v2  ;;  %v727_v6 = vld [vmem:[%s993_s1 + $0x8] sm:$0xff]   ;;  %v730_v9 = vld [vmem:[%s993_s1 + $0x10] sm:$0xff]  }
   0x4   :  { %646 = vmatpush3.bf16.msra.mxu0 %v724_v3  ;;  %304 = vmatprep.subr.bf16.mxu1 %v775_v0  ;;  %v731_v10 = vld [vmem:[%s993_s1 + $0x58] sm:$0xff]   ;;  %v734_v13 = vld [vmem:[%s993_s1 + $0x60] sm:$0xff]   ;;  %v737_v16 = vld [vmem:[%s993_s1 + $0x68] sm:$0xff]  }
   0x5   :  { %647 = vmatprep.subr.bf16.mxu0 %v725_v4  ;;  %v732_v11 = vld [vmem:[%s993_s1 + $0x98] sm:$0xff]   ;;  %v735_v14 = vld [vmem:[%s993_s1 + $0xa0] sm:$0xff]   ;;  %v738_v17 = vld [vmem:[%s993_s1 + $0xa8] sm:$0xff]  }
   0x6   :  { %v733_v12 = vld [vmem:[%s993_s1 + $0x18] sm:$0xff]   ;;  %v736_v15 = vld [vmem:[%s993_s1 + $0x20] sm:$0xff]   ;;  %v739_v18 = vld [vmem:[%s993_s1 + $0x28] sm:$0xff]  }
   0x7   :  { %305 = vmatpush1.bf16.msra.mxu1 %v726_v5  ;;  %v740_v19 = vld [vmem:[%s993_s1 + $0x70] sm:$0xff]   ;;  %v743_v22 = vld [vmem:[%s993_s1 + $0x78] sm:$0xff]   ;;  %v749_v28 = vld [vmem:[%s993_s1 + $0xc0] sm:$0xff]  }
   0x8   :  { %648 = vmatpush3.bf16.msra.mxu0 %v727_v6  ;;  %306 = vmatprep.subr.bf16.mxu1 %v775_v0  ;;  %v741_v20 = vld [vmem:[%s993_s1 + $0xb0] sm:$0xff]   ;;  %v744_v24 = vld [vmem:[%s993_s1 + $0xb8] sm:$0xff]   ;;  %v753_v29 = vld [vmem:[%s995_s3] sm:$0xff]  }
   0x9   :  { %649 = vmatprep.subr.bf16.mxu0 %v728_v7  ;;  %v742_v21 = vld [vmem:[%s993_s1 + $0x30] sm:$0xff]   ;;  %v752_v25 = vld [vmem:[%s994_s0 + $0xc] ss:$16 sps:$4 sm:$0xff]   ;;  %v750_v31 = vld [vmem:[%s994_s0 + $0x8] ss:$16 sps:$4 sm:$0xff]  }
   0xa   :  { %v748_v23 = vld [vmem:[%s994_s0 + $0x4] ss:$16 sps:$4 sm:$0xff]   ;;  %v745_v26 = vld [vmem:[%s993_s1 + $0x38] sm:$0xff]   ;;  %626 = vmatprep.mubr.msk.bf16.mxu1 %vm257_vm0, %v752_v25  ;;  %v746_v27 = vld [vmem:[%s994_s0] ss:$16 sps:$4 sm:$0xff]  }
   0xb   :  { %307 = vmatpush1.bf16.msra.mxu1 %v729_v8  ;;  %293 = vmatprep.mubr.bf16.mxu0 %v748_v23  ;;  %v754_v32 = vld [vmem:[%s995_s3 + $0x8] sm:$0xff]   ;;  %v755_v33 = vld [vmem:[%s995_s3 + $0x10] sm:$0xff]   ;;  %v756_v34 = vld [vmem:[%s995_s3 + $0x18] sm:$0xff]  }
   0xc   :  { %650 = vmatpush3.bf16.msra.mxu0 %v730_v9  ;;  %308 = vmatprep.subr.bf16.mxu1 %v775_v0  ;;  %v757_v35 = vld [vmem:[%s995_s3 + $0x20] sm:$0xff]   ;;  %v758_v36 = vld [vmem:[%s995_s3 + $0x28] sm:$0xff]   ;;  %v759_v37 = vld [vmem:[%s995_s3 + $0x30] sm:$0xff]  }
   0xd   :  { %651 = vmatprep.subr.bf16.mxu0 %v731_v10  ;;  %v760_v38 = vld [vmem:[%s995_s3 + $0x38] ss:$0 sps:$4 sm:$0xff]   ;;  %v761_v40 = vld [vmem:[%s996_s5] sm:$0xff]   ;;  %v762_v41 = vld [vmem:[%s996_s5 + $0x8] sm:$0xff]  }
   0xe   :  { %v419_v39 = vsel %vm417_vm1, %v760_v38, 0  ;;  %v763_v42 = vld [vmem:[%s996_s5 + $0x10] sm:$0xff]   ;;  %v764_v43 = vld [vmem:[%s996_s5 + $0x18] sm:$0xff]   ;;  %v596_v46 = vld [vmem:[%s997_s2] ss:$0 sm:$0xff] }
   0xf   :  { %309 = vmatpush1.bf16.msra.mxu1 %v732_v11  ;;  %v765_v62 = vld [vmem:[%s996_s5 + $0x20] sm:$0xff]   ;;  %v766_v63 = vld [vmem:[%s996_s5 + $0x28] ss:$0 sps:$4 sm:$0x33]  }
  0x10   :  { %652 = vmatpush3.bf16.msra.mxu0 %v733_v12  ;;  %310 = vmatprep.subr.bf16.mxu1 %v775_v0  ;;  %v627_v1 = vld [vmem:[%s998_s4] ss:$0 sm:$0xff] }
  0x11   :  { %653 = vmatprep.subr.bf16.mxu0 %v734_v13  ;;  %v637_v11 = vld [vmem:[%s999_s6] ss:$0 sm:$0xff] }
  0x13   :  { %311 = vmatpush1.bf16.msra.mxu1 %v735_v14 }
  0x14   :  { %654 = vmatpush3.bf16.msra.mxu0 %v736_v15  ;;  %312 = vmatprep.subr.bf16.mxu1 %v775_v0 }
  0x15   :  { %655 = vmatprep.subr.bf16.mxu0 %v737_v16 }
  0x17   :  { %313 = vmatpush1.bf16.msra.mxu1 %v738_v17 }
  0x18   :  { %656 = vmatpush3.bf16.msra.mxu0 %v739_v18  ;;  %314 = vmatprep.subr.bf16.mxu1 %v775_v0 }
  0x19   :  { %657 = vmatprep.subr.bf16.mxu0 %v740_v19 }
  0x1b   :  { %315 = vmatpush1.bf16.msra.mxu1 %v741_v20 }
  0x1c   :  { %658 = vmatpush3.bf16.msra.mxu0 %v742_v21  ;;  %316 = vmatprep.subr.bf16.mxu1 %v775_v0 }
  0x1d   :  { %659 = vmatprep.subr.bf16.mxu0 %v743_v22 }
  0x1f   :  { %317 = vmatpush1.bf16.msra.mxu1 %v744_v24 }
  0x20   :  { %660 = vmatpush3.bf16.msra.mxu0 %v745_v26  ;;  %318 = vmatprep.subr.bf16.mxu1 %v775_v0  ;;  %v522_v0 = vsel %vm520_vm4, %v766_v63, 0 }
  0x21   :  { %683 = vmatprep.subr.bf16.mxu0 %v776_v30 }
  0x23   :  { %294 = vmatmul.mubr.bf16.vlgmr.msra.gmra.mrb[0].mxu0 %v746_v27  ;;  %319 = vmatpush1.bf16.msra.mxu1 %v749_v28 }
  0x24   :  { %684 = vmatpush3.bf16.msra.mxu0 %v753_v29  ;;  %703 = vmatprep.subr.bf16.mxu1 %v776_v30 }
  0x25   :  { %685 = vmatprep.subr.bf16.mxu0 %v776_v30  ;;  %699 = vmatprep.mubr.msk.bf16.mxu0 %vm777_vm2, %v776_v30 }
  0x26   :  { %335 = vmatmul.mubr.bf16.vlgmr.msra.gmra.mrb[0].mxu1 %v750_v31 }
  0x27   :  { %715 = vmatprep.mubr.msk.bf16.mxu1 %vm777_vm2, %v776_v30  ;;  %704 = vmatpush3.bf16.msra.mxu1 %v761_v40 }
  0x28   :  { %686 = vmatpush3.bf16.msra.mxu0 %v754_v32  ;;  %705 = vmatprep.subr.bf16.mxu1 %v776_v30 }
  0x29   :  { %687 = vmatprep.subr.bf16.mxu0 %v776_v30 }
  0x2b   :  { %706 = vmatpush3.bf16.msra.mxu1 %v762_v41 }
  0x2c   :  { %688 = vmatpush3.bf16.msra.mxu0 %v755_v33  ;;  %707 = vmatprep.subr.bf16.mxu1 %v776_v30 }
  0x2d   :  { %689 = vmatprep.subr.bf16.mxu0 %v776_v30 }
  0x2f   :  { %708 = vmatpush3.bf16.msra.mxu1 %v763_v42 }
  0x30   :  { %690 = vmatpush3.bf16.msra.mxu0 %v756_v34  ;;  %709 = vmatprep.subr.bf16.mxu1 %v776_v30 }
  0x31   :  { %691 = vmatprep.subr.bf16.mxu0 %v776_v30 }
  0x33   :  { %710 = vmatpush3.bf16.msra.mxu1 %v764_v43 }
  0x34   :  { %692 = vmatpush3.bf16.msra.mxu0 %v757_v35  ;;  %711 = vmatprep.subr.bf16.mxu1 %v776_v30 }
  0x35   :  { %693 = vmatprep.subr.bf16.mxu0 %v776_v30 }
  0x37   :  { %712 = vmatpush3.bf16.msra.mxu1 %v765_v62 }
  0x38   :  { %694 = vmatpush3.bf16.msra.mxu0 %v758_v36  ;;  %713 = vmatprep.subr.bf16.mxu1 %v776_v30 }
  0x39   :  { %695 = vmatprep.subr.bf16.mxu0 %v776_v30 }
  0x3b   :  { %714 = vmatpush3.bf16.msra.mxu1 %v522_v0 }
  0x3c   :  { %696 = vmatpush3.bf16.msra.mxu0 %v759_v37 }
  0x3d   :  { %697 = vmatprep.subr.bf16.mxu0 %v776_v30 }
  0x40   :  { %698 = vmatpush3.bf16.msra.mxu0 %v419_v39 }
  0xf6   :  { %v661_v44 = vpop.f32.mrb[0].mxu0 }
  0xf7   :  { %v662_v45 = vpop.f32.mrb[1].mxu0 }
  0xf8   :  { %v663_v47 = vadd.f32 %v662_v45, %v661_v44  ;;  %v664_v48 = vpop.f32.mrb[2].mxu0 }
  0xf9   :  { %v665_v49 = vpop.f32.mrb[3].mxu0  ;;  %v336_v50 = vpop.f32.mrb[0].mxu1 }
  0xfa   :  { %v666_v51 = vadd.f32 %v665_v49, %v664_v48  ;;  %v296_v52 = vadd.f32 %v663_v47, %v596_v46  ;;  %v338_v53 = vpop.f32.mrb[1].mxu1 }
  0xfb   :  { %v339_v54 = vpop.f32.mrb[2].mxu1 }
  0xfc   :  { %v337_v55 = vadd.f32 %v336_v50, %v296_v52  ;;  %v299_v56 = vadd.f32 %v666_v51, %v596_v46  ;;  %v341_v57 = vpop.f32.mrb[3].mxu1 }
  0xfe   :  { %v340_v58 = vadd.f32 %v339_v54, %v299_v56  ;;  %v343_v59 = vmax.f32 %v337_v55, 0.0 }
 0x100   :  { %v344_v60 = vmax.f32 %v340_v58, 0.0 }
 0x102   :  { %v345_v61 = vpack.c.bf16 %v344_v60, %v343_v59 }
 0x104   :  { %700 = vmatmul.mubr.msk.bf16.vlgmr.msra.gmra.mrb[4].mxu0 %vm413_vm3, %v345_v61 }
 0x1d7   :  { %v455_v2 = vpop.f32.mrb[4].mxu0 }
 0x1d8   :  { %v456_v3 = vadd.f32 %v627_v1, %v455_v2  ;;  %v701_v4 = vpop.f32.mrb[5].mxu0 }
 0x1d9   :  { %v458_v5 = vpop.f32.mrb[6].mxu0 }
 0x1da   :  { %v459_v6 = vadd.f32 %v627_v1, %v458_v5  ;;  %v702_v7 = vpop.f32.mrb[7].mxu0  ;;  %v462_v8 = vmax.f32 %v456_v3, 0.0 }
 0x1dc   :  { %v463_v9 = vmax.f32 %v459_v6, 0.0 }
 0x1de   :  { %v464_v10 = vpack.c.bf16 %v463_v9, %v462_v8 }
 0x1e0   :  { %716 = vmatmul.mubr.msk.bf16.vlgmr.msra.gmra.mrb[4].mxu1 %vm516_vm5, %v464_v10 }
 0x2b3   :  { %v558_v12 = vpop.f32.mrb[4].mxu1 }
 0x2b4   :  { %v559_v13 = vadd.f32 %v637_v11, %v558_v12  ;;  %v717_v14 = vpop.f32.mrb[5].mxu1 }
 0x2b5   :  { %v561_v15 = vpop.f32.mrb[6].mxu1 }
 0x2b6   :  { %v562_v16 = vadd.f32 %v637_v11, %v561_v15  ;;  %v718_v17 = vpop.f32.mrb[7].mxu1  ;;  %v566_v18 = vsel %vm565_vm6, %v559_v13, -inf }
 0x2b7   :  { %567 = vmax.xlane.f32.xlu0 %v566_v18 }
 0x2b8   :  { %v569_v19 = vsel %vm565_vm6, %v562_v16, -inf }
 0x2bb   :  { %570 = vmax.xlane.f32.xlu0 %v569_v19 }
 0x344   :  { %v568_v20 = vpop.xlane.xlu0 %567 }
 0x345   :  { %v572_v21 = vsub.f32 %v559_v13, %v568_v20 }
 0x347   :  { %v574_v22 = vmul.f32 1.442695, %v572_v21 }
 0x348   :  { %v571_v23 = vpop.xlane.xlu0 %570 }
 0x349   :  { %767 = vpow2.f32 %v574_v22  ;;  %v573_v24 = vsub.f32 %v562_v16, %v571_v23 }
 0x34b   :  { %v576_v25 = vmul.f32 1.442695, %v573_v24 }
 0x34d   :  { %769 = vpow2.f32 %v576_v25 }
 0x353   :  { %v768_v26 = vpop.eup %767 }
 0x354   :  { %v578_v27 = vsel %vm565_vm6, %v768_v26, 0.0 }
 0x355   :  { %579 = vadd.xlane.f32.xlu1 %v578_v27 }
 0x357   :  { %v770_v28 = vpop.eup %769 }
 0x358   :  { %v581_v29 = vsel %vm565_vm6, %v770_v28, 0.0 }
 0x359   :  { %582 = vadd.xlane.f32.xlu1 %v581_v29 }
 0x3e2   :  { %v580_v30 = vpop.xlane.xlu1 %579 }
 0x3e3   :  { %771 = vlog2.f32 %v580_v30 }
 0x3e6   :  { %v583_v31 = vpop.xlane.xlu1 %582 }
 0x3e7   :  { %773 = vlog2.f32 %v583_v31 }
 0x3ed   :  { %v772_v32 = vpop.eup %771 }
 0x3ee   :  { %v585_v33 = vmul.f32 0.6931472, %v772_v32 }
 0x3f0   :  { %v588_v34 = vsub.f32 %v572_v21, %v585_v33 }
 0x3f1   :  { %v774_v35 = vpop.eup %773 }
 0x3f2   :  { %590 = vst.msk [vmem:[%s1000_s7] sm:$0xff] %vm565_vm6, %v588_v34  ;;  %v587_v36 = vmul.f32 0.6931472, %v774_v35 }
 0x3f4   :  { %v589_v37 = vsub.f32 %v573_v24, %v587_v36 }
 0x3f6   :  { %591 = vst.msk [vmem:[%s1000_s7 + $0x8] sm:$0xff] %vm565_vm6, %v589_v37 }

</bundles_post_ra>
